<compile_context>
chip_gen: v6e
topology: v6e:2x2x1
jax: 0.10.0
libtpu: 0.0.40
codegen_flags: <defaults>
</compile_context>

<pallas_src>
import jax
import jax.numpy as jnp
from jax.experimental import pallas as pl
from jax.experimental.pallas import tpu as pltpu

# 60 -(conv k=2)-> 59 -(pool s=1)-> 58 -(conv k=3)-> 56 -(pool s=2)-> 28
L_IN, C_IN = 60, 8
C_MID = 6
L1, P1, L2, P2 = 59, 58, 56, 28
N_OUT = 2
N_FLAT = P2 * C_MID                 # 168 Linear in-features
K0 = C_IN * L_IN                    # 480 flattened input features (c*60 + l)
N1 = L1 * C_MID                     # 354 conv1 outputs (l*6 + o)
N1P = P1 * C_MID                    # 348 pooled-1 outputs
N2 = L2 * C_MID                     # 336 conv2 outputs
NQ = N2 - C_MID                     # 330 un-compacted pooled-2 columns
MAX_TB = 256                        # batch tile (multiple of 8)


def _round_up(n, m):
    return ((n + m - 1) // m) * m


def _choose_tb(B):
    tb = min(MAX_TB, _round_up(B, 8))
    # Prefer >= 2 grid steps so the "parallel" batch axis can use both v7x TCs.
    if tb > 8 and _round_up(B, tb) // tb < 2:
        tb = max(8, _round_up((tb + 1) // 2, 8))
    return tb


def _net_kernel(x_ref, w1_ref, b1_ref, w2_ref, b2_ref, wl_ref, bl_ref, out_ref):
    # x_ref:(TB,480)  w1_ref:(480,354) b1_ref:(1,354)  w2_ref:(348,336)
    # b2_ref:(1,336)  wl_ref:(330,2)   bl_ref:(1,2)    out_ref:(TB,2)
    x = x_ref[...]                                                     # (TB, 480)

    # conv1_1 as a single dense matmul; columns are length-major (l*6 + o).
    y1 = jnp.dot(x, w1_ref[...],
                 preferred_element_type=jnp.float32) + b1_ref[...]    # (TB, 354)

    # maxpl_1: MaxPool1d(2, stride=1) = max with the next position (6 lanes on).
    p1 = jnp.maximum(y1[:, :N1P], y1[:, C_MID:N1])                    # (TB, 348)

    # conv1_2 as a single dense matmul; columns length-major (l*6 + o).
    y2 = jnp.dot(p1, w2_ref[...],
                 preferred_element_type=jnp.float32) + b2_ref[...]    # (TB, 336)

    # maxpl_2: MaxPool1d(2, stride=2).  Pairs sit 6 lanes apart; keep the
    # un-compacted max (odd-pair columns are garbage) and let the zero rows of
    # wl_ref discard them in the final matmul.
    q = jnp.maximum(y2[:, :NQ], y2[:, C_MID:N2])                      # (TB, 330)

    # o2s: Linear(168, 2) (weights pre-expanded/permuted to the q layout).
    z = jnp.dot(q, wl_ref[...],
                preferred_element_type=jnp.float32) + bl_ref[...]     # (TB, 2)

    # LogSoftmax(dim=1)
    m = jnp.max(z, axis=-1, keepdims=True)
    lse = jnp.log(jnp.sum(jnp.exp(z - m), axis=-1, keepdims=True))
    out_ref[...] = z - m - lse


def _prepare_params(params):
    """Build dense, lane-dense-N weight matrices for the kernel (one-time)."""
    w1, b1, w2, b2, wl, bl = params
    f32 = jnp.float32

    # conv1 -> dense (480, 354):  W1d[c*60 + (l+k), l*6 + o] = w1[o, c, k]
    s1 = jnp.stack([jnp.eye(L_IN, L1, k=-k, dtype=f32) for k in range(2)])
    w1d = jnp.einsum('kml,ock->cmlo', s1, w1.astype(f32)).reshape(K0, N1)

    # conv2 -> dense (348, 336):  W2d[(l2+k)*6 + c, l2*6 + o] = w2[o, c, k]
    s2 = jnp.stack([jnp.eye(P1, L2, k=-k, dtype=f32) for k in range(3)])
    w2d = jnp.einsum('kml,ock->mclo', s2, w2.astype(f32)).reshape(N1P, N2)

    # Linear(168,2) expanded to the un-compacted pool-2 layout (330, 2):
    # valid rows are 12*p + o (even pair) and hold wl[s, o*28 + p]; odd-pair
    # rows are zero so the pool-2 garbage columns are discarded for free.
    wl_r = wl.astype(f32).reshape(N_OUT, C_MID, P2)                    # (s, o, p)
    wle = jnp.zeros((P2, 2, C_MID, N_OUT), f32)
    wle = wle.at[:, 0, :, :].set(jnp.transpose(wl_r, (2, 1, 0)))       # (p, o, s)
    wle = wle.reshape(2 * N2 // 2, N_OUT)[:NQ]                         # (330, 2)

    b1v = jnp.tile(b1.astype(f32), L1).reshape(1, N1)                  # (1, 354)
    b2v = jnp.tile(b2.astype(f32), L2).reshape(1, N2)                  # (1, 336)
    blr = bl.astype(f32).reshape(1, N_OUT)
    return w1d, b1v, w2d, b2v, wle, blr


def net_forward(x, hidden, params):
    """x: (B, 8, 60) float32 (PyTorch NCW). Returns (log-probs (B, 2), hidden)."""
    B = x.shape[0]
    TB = _choose_tb(B)
    B_pad = _round_up(B, TB)

    # Free, contiguous flatten of the raw NCW input (no transpose, no HBM pass).
    x2d = x.astype(jnp.float32).reshape(B, K0)                         # (B, 480)
    if B_pad != B:
        x2d = jnp.pad(x2d, ((0, B_pad - B), (0, 0)))

    w1d, b1v, w2d, b2v, wle, blr = _prepare_params(params)

    out = pl.pallas_call(
        _net_kernel,
        out_shape=jax.ShapeDtypeStruct((B_pad, N_OUT), jnp.float32),
        grid=(B_pad // TB,),
        in_specs=[
            pl.BlockSpec((TB, K0), lambda b: (b, 0)),       # input (lane-dense)
            pl.BlockSpec((K0, N1), lambda b: (0, 0)),       # conv1 dense weights
            pl.BlockSpec((1, N1), lambda b: (0, 0)),
            pl.BlockSpec((N1P, N2), lambda b: (0, 0)),      # conv2 dense weights
            pl.BlockSpec((1, N2), lambda b: (0, 0)),
            pl.BlockSpec((NQ, N_OUT), lambda b: (0, 0)),    # expanded linear
            pl.BlockSpec((1, N_OUT), lambda b: (0, 0)),
        ],
        out_specs=pl.BlockSpec((TB, N_OUT), lambda b: (b, 0)),
        compiler_params=pltpu.CompilerParams(
            dimension_semantics=("parallel",),
            vmem_limit_bytes=32 * 1024 * 1024),
    )(x2d, w1d, b1v, w2d, b2v, wle, blr)
    # hidden is passed through unchanged, exactly like the PyTorch forward.
    return out[:B], hidden


def init_params(key):
    ks = jax.random.split(key, 6)

    def u(k, shape, fan_in):
        bound = 1.0 / float(fan_in) ** 0.5
        return jax.random.uniform(k, shape, jnp.float32, -bound, bound)

    w1 = u(ks[0], (6, 8, 2), 8 * 2)     # Conv1d(8, 6, 2)
    b1 = u(ks[1], (6,), 8 * 2)
    w2 = u(ks[2], (6, 6, 3), 6 * 3)     # Conv1d(6, 6, 3)
    b2 = u(ks[3], (6,), 6 * 3)
    wl = u(ks[4], (2, 168), 168)        # Linear(168, 2)
    bl = u(ks[5], (2,), 168)
    return (w1, b1, w2, b2, wl, bl)


def ref_forward(x, hidden, params):
    """Pure-JAX (NCW) reference mirroring the PyTorch graph."""
    w1, b1, w2, b2, wl, bl = params
    y = b1[None, :, None] + sum(
        jnp.einsum('oc,bcl->bol', w1[:, :, k], x[:, :, k:k + 59]) for k in range(2))
    y = jnp.maximum(y[:, :, :-1], y[:, :, 1:])
    y = b2[None, :, None] + sum(
        jnp.einsum('oc,bcl->bol', w2[:, :, k], y[:, :, k:k + 56]) for k in range(3))
    y = jnp.maximum(y[:, :, 0:56:2], y[:, :, 1:56:2])
    z = y.reshape(-1, 168) @ wl.T + bl
    return jax.nn.log_softmax(z, axis=1), hidden


if __name__ == "__main__":
    key = jax.random.PRNGKey(0)
    kx, kp = jax.random.split(key)
    params = init_params(kp)
    hidden = jnp.zeros((4, 16, 9), jnp.float32)    # net.initHidden()

    # Small check (B=2, one TB=8 block) plus one that exercises batch padding
    # and a multi-step parallel grid (B=70 -> two TB=40 blocks).
    for B in (2, 70):
        x = jax.random.normal(jax.random.fold_in(kx, B), (B, C_IN, L_IN), jnp.float32)
        out, hid = net_forward(x, hidden, params)
        out = jax.block_until_ready(out)
        ref, _ = ref_forward(x, hidden, params)
        assert out.shape == (B, N_OUT)
        assert hid.shape == (4, 16, 9)
        assert jnp.allclose(out, ref, atol=1e-3, rtol=1e-3), f"mismatch at B={B}"
    print("KERNEL_OK")
</pallas_src>

<mosaic_0001>
module attributes {stable_mosaic.version = 11 : i64} {
  func.func @_net_kernel(%arg0: i32, %arg1: memref<8x480xf32, #tpu.memory_space<vmem>>, %arg2: memref<480x354xf32, #tpu.memory_space<vmem>>, %arg3: memref<1x354xf32, #tpu.memory_space<vmem>>, %arg4: memref<348x336xf32, #tpu.memory_space<vmem>>, %arg5: memref<1x336xf32, #tpu.memory_space<vmem>>, %arg6: memref<330x2xf32, #tpu.memory_space<vmem>>, %arg7: memref<1x2xf32, #tpu.memory_space<vmem>>, %arg8: memref<8x2xf32, #tpu.memory_space<vmem>>) attributes {dimension_semantics = [#tpu.dimension_semantics<parallel>], iteration_bounds = array<i64: 1>, scalar_prefetch = 0 : i64, scratch_operands = 0 : i64, tpu.core_type = #tpu.core_type<tc>, window_params = [{transform_indices = @transform_0, window_bounds = array<i64: 8, 480>}, {pipeline_mode = #tpu.pipeline_mode<synchronous>, transform_indices = @transform_1, window_bounds = array<i64: 480, 354>}, {pipeline_mode = #tpu.pipeline_mode<synchronous>, transform_indices = @transform_2, window_bounds = array<i64: 1, 354>}, {pipeline_mode = #tpu.pipeline_mode<synchronous>, transform_indices = @transform_3, window_bounds = array<i64: 348, 336>}, {pipeline_mode = #tpu.pipeline_mode<synchronous>, transform_indices = @transform_4, window_bounds = array<i64: 1, 336>}, {pipeline_mode = #tpu.pipeline_mode<synchronous>, transform_indices = @transform_5, window_bounds = array<i64: 330, 2>}, {pipeline_mode = #tpu.pipeline_mode<synchronous>, transform_indices = @transform_6, window_bounds = array<i64: 1, 2>}, {transform_indices = @transform_7, window_bounds = array<i64: 8, 2>}]} {
    %c0 = arith.constant 0 : index
    %c0_0 = arith.constant 0 : index
    %0 = vector.load %arg1[%c0, %c0_0] : memref<8x480xf32, #tpu.memory_space<vmem>>, vector<8x480xf32>
    %c0_1 = arith.constant 0 : index
    %c0_2 = arith.constant 0 : index
    %1 = vector.load %arg2[%c0_1, %c0_2] : memref<480x354xf32, #tpu.memory_space<vmem>>, vector<480x354xf32>
    %cst = arith.constant dense<0.000000e+00> : vector<8x354xf32>
    %2 = tpu.matmul %0, %1, %cst {dimension_numbers = #tpu.dot_dimension_numbers<[1], [0], [0], [1], [0, 0, 1, 1], [], []>} : vector<8x480xf32>, vector<480x354xf32>, vector<8x354xf32> -> vector<8x354xf32>
    %c0_3 = arith.constant 0 : index
    %c0_4 = arith.constant 0 : index
    %3 = vector.load %arg3[%c0_3, %c0_4] : memref<1x354xf32, #tpu.memory_space<vmem>>, vector<1x354xf32>
    %4 = vector.broadcast %3 : vector<1x354xf32> to vector<8x354xf32>
    %5 = arith.addf %2, %4 : vector<8x354xf32>
    %6 = vector.extract_strided_slice %5 {offsets = [0, 0], sizes = [8, 348], strides = [1, 1]} : vector<8x354xf32> to vector<8x348xf32>
    %7 = vector.extract_strided_slice %5 {offsets = [0, 6], sizes = [8, 348], strides = [1, 1]} : vector<8x354xf32> to vector<8x348xf32>
    %8 = arith.maximumf %6, %7 : vector<8x348xf32>
    %c0_5 = arith.constant 0 : index
    %c0_6 = arith.constant 0 : index
    %9 = vector.load %arg4[%c0_5, %c0_6] : memref<348x336xf32, #tpu.memory_space<vmem>>, vector<348x336xf32>
    %cst_7 = arith.constant dense<0.000000e+00> : vector<8x336xf32>
    %10 = tpu.matmul %8, %9, %cst_7 {dimension_numbers = #tpu.dot_dimension_numbers<[1], [0], [0], [1], [0, 0, 1, 1], [], []>} : vector<8x348xf32>, vector<348x336xf32>, vector<8x336xf32> -> vector<8x336xf32>
    %c0_8 = arith.constant 0 : index
    %c0_9 = arith.constant 0 : index
    %11 = vector.load %arg5[%c0_8, %c0_9] : memref<1x336xf32, #tpu.memory_space<vmem>>, vector<1x336xf32>
    %12 = vector.broadcast %11 : vector<1x336xf32> to vector<8x336xf32>
    %13 = arith.addf %10, %12 : vector<8x336xf32>
    %14 = vector.extract_strided_slice %13 {offsets = [0, 0], sizes = [8, 330], strides = [1, 1]} : vector<8x336xf32> to vector<8x330xf32>
    %15 = vector.extract_strided_slice %13 {offsets = [0, 6], sizes = [8, 330], strides = [1, 1]} : vector<8x336xf32> to vector<8x330xf32>
    %16 = arith.maximumf %14, %15 : vector<8x330xf32>
    %c0_10 = arith.constant 0 : index
    %c0_11 = arith.constant 0 : index
    %17 = vector.load %arg6[%c0_10, %c0_11] : memref<330x2xf32, #tpu.memory_space<vmem>>, vector<330x2xf32>
    %cst_12 = arith.constant dense<0.000000e+00> : vector<8x2xf32>
    %18 = tpu.matmul %16, %17, %cst_12 {dimension_numbers = #tpu.dot_dimension_numbers<[1], [0], [0], [1], [0, 0, 1, 1], [], []>} : vector<8x330xf32>, vector<330x2xf32>, vector<8x2xf32> -> vector<8x2xf32>
    %c0_13 = arith.constant 0 : index
    %c0_14 = arith.constant 0 : index
    %19 = vector.load %arg7[%c0_13, %c0_14] : memref<1x2xf32, #tpu.memory_space<vmem>>, vector<1x2xf32>
    %20 = vector.broadcast %19 : vector<1x2xf32> to vector<8x2xf32>
    %21 = arith.addf %18, %20 : vector<8x2xf32>
    %cst_15 = arith.constant dense<0xFF800000> : vector<8xf32>
    %22 = vector.multi_reduction <maximumf>, %21, %cst_15 [1] : vector<8x2xf32> to vector<8xf32>
    %23 = vector.shape_cast %22 : vector<8xf32> to vector<8x1xf32>
    %24 = vector.broadcast %23 : vector<8x1xf32> to vector<8x2xf32>
    %25 = arith.subf %21, %24 : vector<8x2xf32>
    %26 = math.exp %25 : vector<8x2xf32>
    %cst_16 = arith.constant dense<0.000000e+00> : vector<8xf32>
    %27 = vector.multi_reduction <add>, %26, %cst_16 [1] : vector<8x2xf32> to vector<8xf32>
    %28 = vector.shape_cast %27 : vector<8xf32> to vector<8x1xf32>
    %29 = math.log %28 : vector<8x1xf32>
    %30 = vector.broadcast %23 : vector<8x1xf32> to vector<8x2xf32>
    %31 = arith.subf %21, %30 : vector<8x2xf32>
    %32 = vector.broadcast %29 : vector<8x1xf32> to vector<8x2xf32>
    %33 = arith.subf %31, %32 : vector<8x2xf32>
    %c0_17 = arith.constant 0 : index
    %c0_18 = arith.constant 0 : index
    %34 = vector.load %arg8[%c0_17, %c0_18] : memref<8x2xf32, #tpu.memory_space<vmem>>, vector<8x2xf32>
    tpu.vector_store %arg8[%c0_17, %c0_18], %33 {strides = array<i32>} : memref<8x2xf32, #tpu.memory_space<vmem>>, vector<8x2xf32>,
    return
  }
  func.func @transform_0(%arg0: i32) -> (i32, i32) {
    %c0_i32 = arith.constant 0 : i32
    %c0_i32_0 = arith.constant 0 : i32
    return %arg0, %c0_i32 : i32, i32
  }
  func.func @transform_1(%arg0: i32) -> (i32, i32) {
    %c0_i32 = arith.constant 0 : i32
    %c0_i32_0 = arith.constant 0 : i32
    %c0_i32_1 = arith.constant 0 : i32
    return %c0_i32, %c0_i32_0 : i32, i32
  }
  func.func @transform_2(%arg0: i32) -> (i32, i32) {
    %c0_i32 = arith.constant 0 : i32
    %c0_i32_0 = arith.constant 0 : i32
    %c0_i32_1 = arith.constant 0 : i32
    return %c0_i32, %c0_i32_0 : i32, i32
  }
  func.func @transform_3(%arg0: i32) -> (i32, i32) {
    %c0_i32 = arith.constant 0 : i32
    %c0_i32_0 = arith.constant 0 : i32
    %c0_i32_1 = arith.constant 0 : i32
    return %c0_i32, %c0_i32_0 : i32, i32
  }
  func.func @transform_4(%arg0: i32) -> (i32, i32) {
    %c0_i32 = arith.constant 0 : i32
    %c0_i32_0 = arith.constant 0 : i32
    %c0_i32_1 = arith.constant 0 : i32
    return %c0_i32, %c0_i32_0 : i32, i32
  }
  func.func @transform_5(%arg0: i32) -> (i32, i32) {
    %c0_i32 = arith.constant 0 : i32
    %c0_i32_0 = arith.constant 0 : i32
    %c0_i32_1 = arith.constant 0 : i32
    return %c0_i32, %c0_i32_0 : i32, i32
  }
  func.func @transform_6(%arg0: i32) -> (i32, i32) {
    %c0_i32 = arith.constant 0 : i32
    %c0_i32_0 = arith.constant 0 : i32
    %c0_i32_1 = arith.constant 0 : i32
    return %c0_i32, %c0_i32_0 : i32, i32
  }
  func.func @transform_7(%arg0: i32) -> (i32, i32) {
    %c0_i32 = arith.constant 0 : i32
    %c0_i32_0 = arith.constant 0 : i32
    return %arg0, %c0_i32 : i32, i32
  }
}

</mosaic_0001>

<bundles_post_ra>
// kernel: tpu_custom_call.1
= control target key start
LH: loop header
LB: loop body
LE: loop exit
PB: predicated region body
PF: predicated region fallthrough
CT: control target
= control target key end

     0   :  { %vm227_vm0 = vcmask 785408   ;;  %vm684_vm1 = vcmask 1043456   ;;  %s1415_s23 = smov 122   ;;  %vm680_vm2 = vcmask 752640   ;;  %vm522_vm3 = vcmask 998400   ;;  %s2668_s1 = inlined_call_operand.vmem [shape: f32[480,354], index: 1, kind: input, shape index: {}]   ;;  %s2669_s0 = inlined_call_operand.vmem [shape: f32[8,480], index: 0, kind: input, shape index: {}]   ;;  %s2670_s3 = inlined_call_operand.vmem [shape: f32[348,336], index: 3, kind: input, shape index: {}]   ;;  %s2671_s2 = inlined_call_operand.vmem [shape: f32[1,354], index: 2, kind: input, shape index: {}]   ;;  %s2672_s5 = inlined_call_operand.vmem [shape: f32[330,2], index: 5, kind: input, shape index: {}]   ;;  %s2673_s4 = inlined_call_operand.vmem [shape: f32[1,336], index: 4, kind: input, shape index: {}]   ;;  %s2674_s6 = inlined_call_operand.vmem [shape: f32[1,2], index: 6, kind: input, shape index: {}]   ;;  %s2675_s7 = inlined_call_operand.vmem [shape: f32[8,2], index: 7, kind: output, shape index: {}]  }
   0x1   :  { %v76_v0 = vld [vmem:[%s2668_s1 + $0x170] sm:$0xff]  ;;  %v75_v1 = vld [vmem:[%s2668_s1 + $0x168] sm:$0xff]  ;;  %v73_v2 = vld [vmem:[%s2668_s1 + $0x158] sm:$0xff]  ;;  %vm1416_vm4 = vmmov 0   ;;  %vm1046_vm5 = vcmask 1041408   ;;  %vm1042_vm6 = vcmask 605184  }
   0x2   :  { %231 = vmatprep.subr.mxu0 %v76_v0  ;;  %v72_v3 = vld [vmem:[%s2668_s1 + $0x150] sm:$0xff]  ;;  %v70_v4 = vld [vmem:[%s2668_s1 + $0x140] sm:$0xff]  ;;  %v69_v5 = vld [vmem:[%s2668_s1 + $0x138] sm:$0xff]  ;;  %vm1190_vm7 = vcmask 15360  }
   0x3   :  { %232 = vmatpush1.msra.mxu0 %v75_v1  ;;  %v172_v6 = vld [vmem:[%s2668_s1 + $0x470] sm:$0xff]  ;;  %v67_v7 = vld [vmem:[%s2668_s1 + $0x128] sm:$0xff]  ;;  %v66_v9 = vld [vmem:[%s2668_s1 + $0x120] sm:$0xff] }
   0x4   :  { %233 = vmatprep.subr.mxu0 %v73_v2  ;;  %302 = vmatprep.subr.mxu1 %v172_v6  ;;  %v171_v8 = vld [vmem:[%s2668_s1 + $0x468] sm:$0xff]  ;;  %v169_v10 = vld [vmem:[%s2668_s1 + $0x458] sm:$0xff]  ;;  %v168_v11 = vld [vmem:[%s2668_s1 + $0x450] sm:$0xff] }
   0x5   :  { %234 = vmatpush1.msra.mxu0 %v72_v3  ;;  %303 = vmatpush1.msra.mxu1 %v171_v8  ;;  %v64_v12 = vld [vmem:[%s2668_s1 + $0x110] sm:$0xff]  ;;  %v166_v13 = vld [vmem:[%s2668_s1 + $0x440] sm:$0xff]  ;;  %v63_v14 = vld [vmem:[%s2668_s1 + $0x108] sm:$0xff] }
   0x6   :  { %235 = vmatprep.subr.mxu0 %v70_v4  ;;  %304 = vmatprep.subr.mxu1 %v169_v10  ;;  %v165_v15 = vld [vmem:[%s2668_s1 + $0x438] sm:$0xff]  ;;  %v163_v16 = vld [vmem:[%s2668_s1 + $0x428] sm:$0xff]  ;;  %v162_v18 = vld [vmem:[%s2668_s1 + $0x420] sm:$0xff] }
   0x7   :  { %236 = vmatpush1.msra.mxu0 %v69_v5  ;;  %305 = vmatpush1.msra.mxu1 %v168_v11  ;;  %v61_v17 = vld [vmem:[%s2668_s1 + $0xf8] sm:$0xff]  ;;  %v60_v19 = vld [vmem:[%s2668_s1 + $0xf0] sm:$0xff]  ;;  %v58_v21 = vld [vmem:[%s2668_s1 + $0xe0] sm:$0xff] }
   0x8   :  { %237 = vmatprep.subr.mxu0 %v67_v7  ;;  %306 = vmatprep.subr.mxu1 %v166_v13  ;;  %v160_v20 = vld [vmem:[%s2668_s1 + $0x410] sm:$0xff]  ;;  %v159_v22 = vld [vmem:[%s2668_s1 + $0x408] sm:$0xff]  ;;  %v57_v23 = vld [vmem:[%s2668_s1 + $0xd8] sm:$0xff] }
   0x9   :  { %238 = vmatpush1.msra.mxu0 %v66_v9  ;;  %307 = vmatpush1.msra.mxu1 %v165_v15  ;;  %v157_v24 = vld [vmem:[%s2668_s1 + $0x3f8] sm:$0xff]  ;;  %v55_v25 = vld [vmem:[%s2668_s1 + $0xc8] sm:$0xff]  ;;  %v156_v26 = vld [vmem:[%s2668_s1 + $0x3f0] sm:$0xff] }
   0xa   :  { %239 = vmatprep.subr.mxu0 %v64_v12  ;;  %308 = vmatprep.subr.mxu1 %v163_v16  ;;  %v54_v27 = vld [vmem:[%s2668_s1 + $0xc0] sm:$0xff]  ;;  %v52_v29 = vld [vmem:[%s2668_s1 + $0xb0] sm:$0xff]  ;;  %v153_v30 = vld [vmem:[%s2668_s1 + $0x3d8] sm:$0xff] }
   0xb   :  { %240 = vmatpush1.msra.mxu0 %v63_v14  ;;  %309 = vmatpush1.msra.mxu1 %v162_v18  ;;  %v154_v28 = vld [vmem:[%s2668_s1 + $0x3e0] sm:$0xff]  ;;  %v51_v31 = vld [vmem:[%s2668_s1 + $0xa8] sm:$0xff]  ;;  %v49_v33 = vld [vmem:[%s2668_s1 + $0x98] sm:$0xff] }
   0xc   :  { %241 = vmatprep.subr.mxu0 %v61_v17  ;;  %310 = vmatprep.subr.mxu1 %v160_v20  ;;  %v151_v32 = vld [vmem:[%s2668_s1 + $0x3c8] sm:$0xff]  ;;  %v150_v34 = vld [vmem:[%s2668_s1 + $0x3c0] sm:$0xff]  ;;  %v48_v35 = vld [vmem:[%s2668_s1 + $0x90] sm:$0xff] }
   0xd   :  { %242 = vmatpush1.msra.mxu0 %v60_v19  ;;  %311 = vmatpush1.msra.mxu1 %v159_v22  ;;  %v148_v36 = vld [vmem:[%s2668_s1 + $0x3b0] sm:$0xff]  ;;  %v46_v37 = vld [vmem:[%s2668_s1 + $0x80] sm:$0xff]  ;;  %v147_v38 = vld [vmem:[%s2668_s1 + $0x3a8] sm:$0xff] }
   0xe   :  { %243 = vmatprep.subr.mxu0 %v58_v21  ;;  %312 = vmatprep.subr.mxu1 %v157_v24  ;;  %v45_v39 = vld [vmem:[%s2668_s1 + $0x78] sm:$0xff]  ;;  %v43_v41 = vld [vmem:[%s2668_s1 + $0x68] sm:$0xff]  ;;  %v144_v42 = vld [vmem:[%s2668_s1 + $0x390] sm:$0xff] }
   0xf   :  { %244 = vmatpush1.msra.mxu0 %v57_v23  ;;  %313 = vmatpush1.msra.mxu1 %v156_v26  ;;  %v145_v40 = vld [vmem:[%s2668_s1 + $0x398] sm:$0xff]  ;;  %v42_v43 = vld [vmem:[%s2668_s1 + $0x60] sm:$0xff]  ;;  %v40_v45 = vld [vmem:[%s2668_s1 + $0x50] sm:$0xff] }
  0x10   :  { %245 = vmatprep.subr.mxu0 %v55_v25  ;;  %314 = vmatprep.subr.mxu1 %v154_v28  ;;  %v142_v44 = vld [vmem:[%s2668_s1 + $0x380] sm:$0xff]  ;;  %v141_v46 = vld [vmem:[%s2668_s1 + $0x378] sm:$0xff]  ;;  %v39_v47 = vld [vmem:[%s2668_s1 + $0x48] sm:$0xff] }
  0x11   :  { %246 = vmatpush1.msra.mxu0 %v54_v27  ;;  %315 = vmatpush1.msra.mxu1 %v153_v30  ;;  %v139_v48 = vld [vmem:[%s2668_s1 + $0x368] sm:$0xff]  ;;  %v37_v49 = vld [vmem:[%s2668_s1 + $0x38] sm:$0xff]  ;;  %v138_v50 = vld [vmem:[%s2668_s1 + $0x360] sm:$0xff] }
  0x12   :  { %247 = vmatprep.subr.mxu0 %v52_v29  ;;  %316 = vmatprep.subr.mxu1 %v151_v32  ;;  %v36_v51 = vld [vmem:[%s2668_s1 + $0x30] sm:$0xff]  ;;  %v34_v53 = vld [vmem:[%s2668_s1 + $0x20] sm:$0xff]  ;;  %v135_v54 = vld [vmem:[%s2668_s1 + $0x348] sm:$0xff] }
  0x13   :  { %248 = vmatpush1.msra.mxu0 %v51_v31  ;;  %317 = vmatpush1.msra.mxu1 %v150_v34  ;;  %v136_v52 = vld [vmem:[%s2668_s1 + $0x350] sm:$0xff]  ;;  %v33_v55 = vld [vmem:[%s2668_s1 + $0x18] sm:$0xff]  ;;  %v31_v57 = vld [vmem:[%s2668_s1 + $0x8] sm:$0xff] }
  0x14   :  { %249 = vmatprep.subr.mxu0 %v49_v33  ;;  %318 = vmatprep.subr.mxu1 %v148_v36  ;;  %v133_v56 = vld [vmem:[%s2668_s1 + $0x338] sm:$0xff]  ;;  %v132_v58 = vld [vmem:[%s2668_s1 + $0x330] sm:$0xff]  ;;  %v30_v59 = vld [vmem:[%s2668_s1] sm:$0xff] }
  0x15   :  { %250 = vmatpush1.msra.mxu0 %v48_v35  ;;  %319 = vmatpush1.msra.mxu1 %v147_v38  ;;  %v130_v60 = vld [vmem:[%s2668_s1 + $0x320] sm:$0xff]  ;;  %v124_v61 = vld [vmem:[%s2668_s1 + $0x2f0] sm:$0xff]  ;;  %v129_v62 = vld [vmem:[%s2668_s1 + $0x318] sm:$0xff] }
  0x16   :  { %251 = vmatprep.subr.mxu0 %v46_v37  ;;  %320 = vmatprep.subr.mxu1 %v145_v40  ;;  %v123_v63 = vld [vmem:[%s2668_s1 + $0x2e8] sm:$0xff]  ;;  %v121_v1 = vld [vmem:[%s2668_s1 + $0x2d8] sm:$0xff]  ;;  %v126_v2 = vld [vmem:[%s2668_s1 + $0x300] sm:$0xff] }
  0x17   :  { %252 = vmatpush1.msra.mxu0 %v45_v39  ;;  %321 = vmatpush1.msra.mxu1 %v144_v42  ;;  %v127_v0 = vld [vmem:[%s2668_s1 + $0x308] sm:$0xff]  ;;  %v120_v3 = vld [vmem:[%s2668_s1 + $0x2d0] sm:$0xff]  ;;  %v118_v5 = vld [vmem:[%s2668_s1 + $0x2c0] sm:$0xff] }
  0x18   :  { %253 = vmatprep.subr.mxu0 %v43_v41  ;;  %322 = vmatprep.subr.mxu1 %v142_v44  ;;  %v208_v4 = vld [vmem:[%s2668_s1 + $0x590] sm:$0xff]  ;;  %v207_v6 = vld [vmem:[%s2668_s1 + $0x588] sm:$0xff]  ;;  %v117_v7 = vld [vmem:[%s2668_s1 + $0x2b8] sm:$0xff] }
  0x19   :  { %254 = vmatpush1.msra.mxu0 %v42_v43  ;;  %323 = vmatpush1.msra.mxu1 %v141_v46  ;;  %v205_v8 = vld [vmem:[%s2668_s1 + $0x578] sm:$0xff]  ;;  %v115_v9 = vld [vmem:[%s2668_s1 + $0x2a8] sm:$0xff]  ;;  %v204_v10 = vld [vmem:[%s2668_s1 + $0x570] sm:$0xff] }
  0x1a   :  { %255 = vmatprep.subr.mxu0 %v40_v45  ;;  %324 = vmatprep.subr.mxu1 %v139_v48  ;;  %v114_v11 = vld [vmem:[%s2668_s1 + $0x2a0] sm:$0xff]  ;;  %v112_v13 = vld [vmem:[%s2668_s1 + $0x290] sm:$0xff]  ;;  %v201_v14 = vld [vmem:[%s2668_s1 + $0x558] sm:$0xff] }
  0x1b   :  { %256 = vmatpush1.msra.mxu0 %v39_v47  ;;  %325 = vmatpush1.msra.mxu1 %v138_v50  ;;  %v202_v12 = vld [vmem:[%s2668_s1 + $0x560] sm:$0xff]  ;;  %v111_v15 = vld [vmem:[%s2668_s1 + $0x288] sm:$0xff]  ;;  %v109_v17 = vld [vmem:[%s2668_s1 + $0x278] sm:$0xff] }
  0x1c   :  { %257 = vmatprep.subr.mxu0 %v37_v49  ;;  %326 = vmatprep.subr.mxu1 %v136_v52  ;;  %v199_v16 = vld [vmem:[%s2668_s1 + $0x548] sm:$0xff]  ;;  %v198_v18 = vld [vmem:[%s2668_s1 + $0x540] sm:$0xff]  ;;  %v108_v19 = vld [vmem:[%s2668_s1 + $0x270] sm:$0xff] }
  0x1d   :  { %258 = vmatpush1.msra.mxu0 %v36_v51  ;;  %327 = vmatpush1.msra.mxu1 %v135_v54  ;;  %v196_v20 = vld [vmem:[%s2668_s1 + $0x530] sm:$0xff]  ;;  %v106_v21 = vld [vmem:[%s2668_s1 + $0x260] sm:$0xff]  ;;  %v195_v22 = vld [vmem:[%s2668_s1 + $0x528] sm:$0xff] }
  0x1e   :  { %259 = vmatprep.subr.mxu0 %v34_v53  ;;  %328 = vmatprep.subr.mxu1 %v133_v56  ;;  %v105_v23 = vld [vmem:[%s2668_s1 + $0x258] sm:$0xff]  ;;  %v103_v25 = vld [vmem:[%s2668_s1 + $0x248] sm:$0xff]  ;;  %v192_v26 = vld [vmem:[%s2668_s1 + $0x510] sm:$0xff] }
  0x1f   :  { %260 = vmatpush1.msra.mxu0 %v33_v55  ;;  %329 = vmatpush1.msra.mxu1 %v132_v58  ;;  %v193_v24 = vld [vmem:[%s2668_s1 + $0x518] sm:$0xff]  ;;  %v102_v27 = vld [vmem:[%s2668_s1 + $0x240] sm:$0xff]  ;;  %v100_v29 = vld [vmem:[%s2668_s1 + $0x230] sm:$0xff] }
  0x20   :  { %261 = vmatprep.subr.mxu0 %v31_v57  ;;  %330 = vmatprep.subr.mxu1 %v130_v60  ;;  %v190_v28 = vld [vmem:[%s2668_s1 + $0x500] sm:$0xff]  ;;  %v189_v30 = vld [vmem:[%s2668_s1 + $0x4f8] sm:$0xff]  ;;  %v99_v31 = vld [vmem:[%s2668_s1 + $0x228] sm:$0xff] }
  0x21   :  { %262 = vmatpush1.msra.mxu0 %v30_v59  ;;  %331 = vmatpush1.msra.mxu1 %v129_v62  ;;  %v187_v32 = vld [vmem:[%s2668_s1 + $0x4e8] sm:$0xff]  ;;  %v97_v33 = vld [vmem:[%s2668_s1 + $0x218] sm:$0xff]  ;;  %v186_v34 = vld [vmem:[%s2668_s1 + $0x4e0] sm:$0xff] }
  0x22   :  { %263 = vmatprep.subr.mxu0 %v124_v61  ;;  %332 = vmatprep.subr.mxu1 %v127_v0  ;;  %v96_v35 = vld [vmem:[%s2668_s1 + $0x210] sm:$0xff]  ;;  %v94_v37 = vld [vmem:[%s2668_s1 + $0x200] sm:$0xff]  ;;  %v183_v38 = vld [vmem:[%s2668_s1 + $0x4c8] sm:$0xff] }
  0x23   :  { %264 = vmatpush2.msra.mxu0 %v123_v63  ;;  %333 = vmatpush1.msra.mxu1 %v126_v2  ;;  %v184_v36 = vld [vmem:[%s2668_s1 + $0x4d0] sm:$0xff]  ;;  %v93_v39 = vld [vmem:[%s2668_s1 + $0x1f8] sm:$0xff]  ;;  %v91_v41 = vld [vmem:[%s2668_s1 + $0x1e8] sm:$0xff] }
  0x24   :  { %265 = vmatprep.subr.mxu0 %v121_v1  ;;  %342 = vmatprep.subr.mxu1 %v208_v4  ;;  %v181_v40 = vld [vmem:[%s2668_s1 + $0x4b8] sm:$0xff]  ;;  %v180_v42 = vld [vmem:[%s2668_s1 + $0x4b0] sm:$0xff]  ;;  %v90_v43 = vld [vmem:[%s2668_s1 + $0x1e0] sm:$0xff]  ;;  %v1414_v1 = vmov 0.0  }
  0x25   :  { %266 = vmatpush2.msra.mxu0 %v120_v3  ;;  %343 = vmatpush2.msra.mxu1 %v207_v6  ;;  %v178_v44 = vld [vmem:[%s2668_s1 + $0x4a0] sm:$0xff]  ;;  %v88_v45 = vld [vmem:[%s2668_s1 + $0x1d0] sm:$0xff]  ;;  %v1790_v46 = vld [vmem:[%s2669_s0 + $0x8] sm:$0xff] }
  0x26   :  { %267 = vmatprep.subr.mxu0 %v118_v5  ;;  %344 = vmatprep.subr.mxu1 %v205_v8  ;;  %v87_v47 = vld [vmem:[%s2668_s1 + $0x1c8] sm:$0xff]  ;;  %v177_v48 = vld [vmem:[%s2668_s1 + $0x498] sm:$0xff]  ;;  %v84_v51 = vld [vmem:[%s2668_s1 + $0x1b0] sm:$0xff] }
  0x27   :  { %268 = vmatpush2.msra.mxu0 %v117_v7  ;;  %345 = vmatpush2.msra.mxu1 %v204_v10  ;;  %v85_v49 = vld [vmem:[%s2668_s1 + $0x1b8] sm:$0xff]  ;;  %v175_v50 = vld [vmem:[%s2668_s1 + $0x488] sm:$0xff]  ;;  %v174_v52 = vld [vmem:[%s2668_s1 + $0x480] sm:$0xff] }
  0x28   :  { %269 = vmatprep.subr.mxu0 %v115_v9  ;;  %346 = vmatprep.subr.mxu1 %v202_v12  ;;  %v82_v53 = vld [vmem:[%s2668_s1 + $0x1a0] sm:$0xff]  ;;  %v1817_v54 = vld [vmem:[%s2669_s0 + $0x18] sm:$0xff]  ;;  %v1825_v56 = vld [vmem:[%s2669_s0 + $0x10] sm:$0xff] }
  0x29   :  { %270 = vmatpush2.msra.mxu0 %v114_v11  ;;  %347 = vmatpush2.msra.mxu1 %v201_v14  ;;  %v81_v55 = vld [vmem:[%s2668_s1 + $0x198] sm:$0xff]  ;;  %v79_v57 = vld [vmem:[%s2668_s1 + $0x188] sm:$0xff]  ;;  %v78_v59 = vld [vmem:[%s2668_s1 + $0x180] sm:$0xff] }
  0x2a   :  { %271 = vmatprep.subr.mxu0 %v112_v13  ;;  %348 = vmatprep.subr.mxu1 %v199_v16  ;;  %v125_v58 = vld [vmem:[%s2668_s1 + $0x2f8] sm:$0xff]  ;;  %v1844_v61 = vld [vmem:[%s2669_s0] sm:$0xff]  ;;  %v119_v3 = vld [vmem:[%s2668_s1 + $0x2c8] sm:$0xff] }
  0x2b   :  { %272 = vmatpush2.msra.mxu0 %v111_v15  ;;  %349 = vmatpush2.msra.mxu1 %v198_v18  ;;  %v77_v60 = vld [vmem:[%s2668_s1 + $0x178] sm:$0xff]  ;;  %v122_v63 = vld [vmem:[%s2668_s1 + $0x2e0] sm:$0xff]  ;;  %v71_v4 = vld [vmem:[%s2668_s1 + $0x148] sm:$0xff] }
  0x2c   :  { %273 = vmatprep.subr.mxu0 %v109_v17  ;;  %350 = vmatprep.subr.mxu1 %v196_v20  ;;  %v173_v62 = vld [vmem:[%s2668_s1 + $0x478] sm:$0xff]  ;;  %v74_v0 = vld [vmem:[%s2668_s1 + $0x160] sm:$0xff]  ;;  %v167_v5 = vld [vmem:[%s2668_s1 + $0x448] sm:$0xff] }
  0x2d   :  { %274 = vmatpush2.msra.mxu0 %v108_v19  ;;  %351 = vmatpush2.msra.mxu1 %v195_v22  ;;  %v170_v2 = vld [vmem:[%s2668_s1 + $0x460] sm:$0xff]  ;;  %v116_v6 = vld [vmem:[%s2668_s1 + $0x2b0] sm:$0xff]  ;;  %v113_v9 = vld [vmem:[%s2668_s1 + $0x298] sm:$0xff] }
  0x2e   :  { %275 = vmatprep.subr.mxu0 %v106_v21  ;;  %352 = vmatprep.subr.mxu1 %v193_v24  ;;  %v68_v7 = vld [vmem:[%s2668_s1 + $0x130] sm:$0xff]  ;;  %v65_v10 = vld [vmem:[%s2668_s1 + $0x118] sm:$0xff]  ;;  %v110_v12 = vld [vmem:[%s2668_s1 + $0x280] sm:$0xff] }
  0x2f   :  { %276 = vmatpush2.msra.mxu0 %v105_v23  ;;  %353 = vmatpush2.msra.mxu1 %v192_v26  ;;  %v164_v8 = vld [vmem:[%s2668_s1 + $0x430] sm:$0xff]  ;;  %v161_v11 = vld [vmem:[%s2668_s1 + $0x418] sm:$0xff]  ;;  %v62_v13 = vld [vmem:[%s2668_s1 + $0x100] sm:$0xff] }
  0x30   :  { %277 = vmatprep.subr.mxu0 %v103_v25  ;;  %354 = vmatprep.subr.mxu1 %v190_v28  ;;  %v158_v14 = vld [vmem:[%s2668_s1 + $0x400] sm:$0xff]  ;;  %v107_v15 = vld [vmem:[%s2668_s1 + $0x268] sm:$0xff]  ;;  %v104_v18 = vld [vmem:[%s2668_s1 + $0x250] sm:$0xff] }
  0x31   :  { %278 = vmatpush2.msra.mxu0 %v102_v27  ;;  %355 = vmatpush2.msra.mxu1 %v189_v30  ;;  %v59_v16 = vld [vmem:[%s2668_s1 + $0xe8] sm:$0xff]  ;;  %v56_v19 = vld [vmem:[%s2668_s1 + $0xd0] sm:$0xff]  ;;  %v101_v21 = vld [vmem:[%s2668_s1 + $0x238] sm:$0xff] }
  0x32   :  { %279 = vmatprep.subr.mxu0 %v100_v29  ;;  %356 = vmatprep.subr.mxu1 %v187_v32  ;;  %v155_v17 = vld [vmem:[%s2668_s1 + $0x3e8] sm:$0xff]  ;;  %v152_v20 = vld [vmem:[%s2668_s1 + $0x3d0] sm:$0xff]  ;;  %v53_v22 = vld [vmem:[%s2668_s1 + $0xb8] sm:$0xff] }
  0x33   :  { %280 = vmatpush2.msra.mxu0 %v99_v31  ;;  %357 = vmatpush2.msra.mxu1 %v186_v34  ;;  %v149_v23 = vld [vmem:[%s2668_s1 + $0x3b8] sm:$0xff]  ;;  %v98_v24 = vld [vmem:[%s2668_s1 + $0x220] sm:$0xff]  ;;  %v95_v27 = vld [vmem:[%s2668_s1 + $0x208] sm:$0xff] }
  0x34   :  { %281 = vmatprep.subr.mxu0 %v97_v33  ;;  %358 = vmatprep.subr.mxu1 %v184_v36  ;;  %v50_v25 = vld [vmem:[%s2668_s1 + $0xa0] sm:$0xff]  ;;  %v47_v28 = vld [vmem:[%s2668_s1 + $0x88] sm:$0xff]  ;;  %v92_v30 = vld [vmem:[%s2668_s1 + $0x1f0] sm:$0xff] }
  0x35   :  { %282 = vmatpush2.msra.mxu0 %v96_v35  ;;  %359 = vmatpush2.msra.mxu1 %v183_v38  ;;  %v146_v26 = vld [vmem:[%s2668_s1 + $0x3a0] sm:$0xff]  ;;  %v143_v29 = vld [vmem:[%s2668_s1 + $0x388] sm:$0xff]  ;;  %v44_v31 = vld [vmem:[%s2668_s1 + $0x70] sm:$0xff] }
  0x36   :  { %283 = vmatprep.subr.mxu0 %v94_v37  ;;  %360 = vmatprep.subr.mxu1 %v181_v40  ;;  %v140_v32 = vld [vmem:[%s2668_s1 + $0x370] sm:$0xff]  ;;  %v89_v33 = vld [vmem:[%s2668_s1 + $0x1d8] sm:$0xff]  ;;  %v86_v36 = vld [vmem:[%s2668_s1 + $0x1c0] sm:$0xff] }
  0x37   :  { %284 = vmatpush2.msra.mxu0 %v93_v39  ;;  %361 = vmatpush2.msra.mxu1 %v180_v42  ;;  %v41_v34 = vld [vmem:[%s2668_s1 + $0x58] sm:$0xff]  ;;  %v38_v37 = vld [vmem:[%s2668_s1 + $0x40] sm:$0xff]  ;;  %v83_v39 = vld [vmem:[%s2668_s1 + $0x1a8] sm:$0xff] }
  0x38   :  { %285 = vmatprep.subr.mxu0 %v91_v41  ;;  %362 = vmatprep.subr.mxu1 %v178_v44  ;;  %v137_v35 = vld [vmem:[%s2668_s1 + $0x358] sm:$0xff]  ;;  %v134_v38 = vld [vmem:[%s2668_s1 + $0x340] sm:$0xff]  ;;  %v35_v40 = vld [vmem:[%s2668_s1 + $0x28] sm:$0xff] }
  0x39   :  { %286 = vmatpush2.msra.mxu0 %v90_v43  ;;  %295 = vmatprep.mubr.f32.mxu0 %v1790_v46  ;;  %v131_v41 = vld [vmem:[%s2668_s1 + $0x328] sm:$0xff]  ;;  %v80_v42 = vld [vmem:[%s2668_s1 + $0x190] sm:$0xff] }
  0x3a   :  { %287 = vmatprep.subr.mxu0 %v88_v45  ;;  %363 = vmatpush2.msra.mxu1 %v177_v48  ;;  %v32_v43 = vld [vmem:[%s2668_s1 + $0x10] sm:$0xff]  ;;  %v209_v45 = vld [vmem:[%s2668_s1 + $0x598] sm:$0xff]  ;;  %v203_v48 = vld [vmem:[%s2668_s1 + $0x568] sm:$0xff] }
  0x3b   :  { %288 = vmatpush2.msra.mxu0 %v87_v47  ;;  %364 = vmatprep.subr.mxu1 %v175_v50  ;;  %v128_v44 = vld [vmem:[%s2668_s1 + $0x310] sm:$0xff]  ;;  %v206_v47 = vld [vmem:[%s2668_s1 + $0x580] sm:$0xff] }
  0x3c   :  { %289 = vmatprep.subr.mxu0 %v85_v49  ;;  %365 = vmatpush2.msra.mxu1 %v174_v52  ;;  %v197_v49 = vld [vmem:[%s2668_s1 + $0x538] sm:$0xff]  ;;  %v194_v50 = vld [vmem:[%s2668_s1 + $0x520] sm:$0xff]  ;;  %v188_v52 = vld [vmem:[%s2668_s1 + $0x4f0] sm:$0xff] }
  0x3d   :  { %290 = vmatpush2.msra.mxu0 %v84_v51  ;;  %1208 = vmatprep.mubr.msk.f32.mxu1 %vm227_vm0, %v1817_v54  ;;  %v191_v51 = vld [vmem:[%s2668_s1 + $0x508] sm:$0xff] }
  0x3e   :  { %291 = vmatprep.subr.mxu0 %v82_v53  ;;  %367 = vmatmul.mubr.f32.vlgmr.msra.gmra.mxu1 %v1825_v56  ;;  %v185_v53 = vld [vmem:[%s2668_s1 + $0x4d8] sm:$0xff] }
  0x3f   :  { %292 = vmatpush2.msra.mxu0 %v81_v55  ;;  %1218 = vmatprep.subr.mxu1 %v125_v58  ;;  %v179_v55 = vld [vmem:[%s2668_s1 + $0x4a8] sm:$0xff]  ;;  %v577_v58 = vld [vmem:[%s2670_s3 + $0x170] sm:$0xff] }
  0x40   :  { %293 = vmatprep.subr.mxu0 %v79_v57  ;;  %1219 = vmatpush3.msra.mxu1 %v77_v60  ;;  %v176_v57 = vld [vmem:[%s2668_s1 + $0x490] sm:$0xff]  ;;  %v574_v60 = vld [vmem:[%s2670_s3 + $0x158] sm:$0xff] }
  0x41   :  { %294 = vmatpush2.msra.mxu0 %v78_v59  ;;  %1220 = vmatprep.subr.mxu1 %v122_v63  ;;  %v576_v59 = vld [vmem:[%s2670_s3 + $0x168] sm:$0xff] }
  0x42   :  { %296 = vmatmul.mubr.f32.vlgmr.msra.gmra.mxu0 %v1844_v61  ;;  %443 = vmatprep.subr.mxu0 %v1414_v1  ;;  %v568_v63 = vld [vmem:[%s2670_s3 + $0x128] sm:$0xff] }
  0x43   :  { %444 = vmatpush1.msra.mxu0 %v173_v62  ;;  %1221 = vmatpush3.msra.mxu1 %v74_v0  ;;  %v570_v62 = vld [vmem:[%s2670_s3 + $0x138] sm:$0xff]  ;;  %v567_v0 = vld [vmem:[%s2670_s3 + $0x120] sm:$0xff] }
  0x44   :  { %445 = vmatprep.subr.mxu0 %v1414_v1  ;;  %1222 = vmatprep.subr.mxu1 %v119_v3  ;;  %v564_v3 = vld [vmem:[%s2670_s3 + $0x108] sm:$0xff] }
  0x45   :  { %446 = vmatpush1.msra.mxu0 %v170_v2  ;;  %1223 = vmatpush3.msra.mxu1 %v71_v4  ;;  %v565_v2 = vld [vmem:[%s2670_s3 + $0x110] sm:$0xff]  ;;  %v562_v4 = vld [vmem:[%s2670_s3 + $0xf8] sm:$0xff] }
  0x46   :  { %447 = vmatprep.subr.mxu0 %v1414_v1  ;;  %1224 = vmatprep.subr.mxu1 %v116_v6  ;;  %v559_v6 = vld [vmem:[%s2670_s3 + $0xe0] sm:$0xff] }
  0x47   :  { %448 = vmatpush1.msra.mxu0 %v167_v5  ;;  %1225 = vmatpush3.msra.mxu1 %v68_v7  ;;  %v561_v5 = vld [vmem:[%s2670_s3 + $0xf0] sm:$0xff]  ;;  %v558_v7 = vld [vmem:[%s2670_s3 + $0xd8] sm:$0xff] }
  0x48   :  { %449 = vmatprep.subr.mxu0 %v1414_v1  ;;  %1226 = vmatprep.subr.mxu1 %v113_v9  ;;  %v660_v9 = vld [vmem:[%s2670_s3 + $0x408] sm:$0xf] }
  0x49   :  { %450 = vmatpush1.msra.mxu0 %v164_v8  ;;  %1227 = vmatpush3.msra.mxu1 %v65_v10  ;;  %v661_v8 = vld [vmem:[%s2670_s3 + $0x410] sm:$0xf]  ;;  %v556_v10 = vld [vmem:[%s2670_s3 + $0xc8] sm:$0xff] }
  0x4a   :  { %451 = vmatprep.subr.mxu0 %v1414_v1  ;;  %1228 = vmatprep.subr.mxu1 %v110_v12  ;;  %v555_v12 = vld [vmem:[%s2670_s3 + $0xc0] sm:$0xff] }
  0x4b   :  { %452 = vmatpush1.msra.mxu0 %v161_v11  ;;  %1229 = vmatpush3.msra.mxu1 %v62_v13  ;;  %v658_v11 = vld [vmem:[%s2670_s3 + $0x3f8] sm:$0xff]  ;;  %v657_v13 = vld [vmem:[%s2670_s3 + $0x3f0] sm:$0xff] }
  0x4c   :  { %453 = vmatprep.subr.mxu0 %v1414_v1  ;;  %1230 = vmatprep.subr.mxu1 %v107_v15  ;;  %v553_v15 = vld [vmem:[%s2670_s3 + $0xb0] sm:$0xff] }
  0x4d   :  { %454 = vmatpush1.msra.mxu0 %v158_v14  ;;  %1231 = vmatpush3.msra.mxu1 %v59_v16  ;;  %v655_v14 = vld [vmem:[%s2670_s3 + $0x3e0] sm:$0xff]  ;;  %v654_v16 = vld [vmem:[%s2670_s3 + $0x3d8] sm:$0xff] }
  0x4e   :  { %455 = vmatprep.subr.mxu0 %v1414_v1  ;;  %1232 = vmatprep.subr.mxu1 %v104_v18  ;;  %v652_v18 = vld [vmem:[%s2670_s3 + $0x3c8] sm:$0xff] }
  0x4f   :  { %456 = vmatpush1.msra.mxu0 %v155_v17  ;;  %1233 = vmatpush3.msra.mxu1 %v56_v19  ;;  %v552_v17 = vld [vmem:[%s2670_s3 + $0xa8] sm:$0xff]  ;;  %v550_v19 = vld [vmem:[%s2670_s3 + $0x98] sm:$0xff] }
  0x50   :  { %457 = vmatprep.subr.mxu0 %v1414_v1  ;;  %1234 = vmatprep.subr.mxu1 %v101_v21  ;;  %v549_v21 = vld [vmem:[%s2670_s3 + $0x90] sm:$0xff] }
  0x51   :  { %458 = vmatpush1.msra.mxu0 %v152_v20  ;;  %1235 = vmatpush3.msra.mxu1 %v53_v22  ;;  %v651_v20 = vld [vmem:[%s2670_s3 + $0x3c0] sm:$0xff]  ;;  %v649_v22 = vld [vmem:[%s2670_s3 + $0x3b0] sm:$0xff] }
  0x52   :  { %459 = vmatprep.subr.mxu0 %v1414_v1  ;;  %1236 = vmatprep.subr.mxu1 %v98_v24  ;;  %v648_v24 = vld [vmem:[%s2670_s3 + $0x3a8] sm:$0xff] }
  0x53   :  { %460 = vmatpush1.msra.mxu0 %v149_v23  ;;  %1237 = vmatpush3.msra.mxu1 %v50_v25  ;;  %v547_v23 = vld [vmem:[%s2670_s3 + $0x80] sm:$0xff]  ;;  %v546_v25 = vld [vmem:[%s2670_s3 + $0x78] sm:$0xff] }
  0x54   :  { %461 = vmatprep.subr.mxu0 %v1414_v1  ;;  %1238 = vmatprep.subr.mxu1 %v95_v27  ;;  %v544_v27 = vld [vmem:[%s2670_s3 + $0x68] sm:$0xff] }
  0x55   :  { %462 = vmatpush1.msra.mxu0 %v146_v26  ;;  %1239 = vmatpush3.msra.mxu1 %v47_v28  ;;  %v646_v26 = vld [vmem:[%s2670_s3 + $0x398] sm:$0xff]  ;;  %v645_v28 = vld [vmem:[%s2670_s3 + $0x390] sm:$0xff] }
  0x56   :  { %463 = vmatprep.subr.mxu0 %v1414_v1  ;;  %1240 = vmatprep.subr.mxu1 %v92_v30  ;;  %v643_v30 = vld [vmem:[%s2670_s3 + $0x380] sm:$0xff] }
  0x57   :  { %464 = vmatpush1.msra.mxu0 %v143_v29  ;;  %1241 = vmatpush3.msra.mxu1 %v44_v31  ;;  %v543_v29 = vld [vmem:[%s2670_s3 + $0x60] sm:$0xff]  ;;  %v541_v31 = vld [vmem:[%s2670_s3 + $0x50] sm:$0xff] }
  0x58   :  { %465 = vmatprep.subr.mxu0 %v1414_v1  ;;  %1242 = vmatprep.subr.mxu1 %v89_v33  ;;  %v540_v33 = vld [vmem:[%s2670_s3 + $0x48] sm:$0xff] }
  0x59   :  { %466 = vmatpush1.msra.mxu0 %v140_v32  ;;  %1243 = vmatpush3.msra.mxu1 %v41_v34  ;;  %v642_v32 = vld [vmem:[%s2670_s3 + $0x378] sm:$0xff]  ;;  %v640_v34 = vld [vmem:[%s2670_s3 + $0x368] sm:$0xff] }
  0x5a   :  { %467 = vmatprep.subr.mxu0 %v1414_v1  ;;  %1244 = vmatprep.subr.mxu1 %v86_v36  ;;  %v639_v36 = vld [vmem:[%s2670_s3 + $0x360] sm:$0xff] }
  0x5b   :  { %468 = vmatpush1.msra.mxu0 %v137_v35  ;;  %1245 = vmatpush3.msra.mxu1 %v38_v37  ;;  %v538_v35 = vld [vmem:[%s2670_s3 + $0x38] sm:$0xff]  ;;  %v537_v37 = vld [vmem:[%s2670_s3 + $0x30] sm:$0xff] }
  0x5c   :  { %469 = vmatprep.subr.mxu0 %v1414_v1  ;;  %1246 = vmatprep.subr.mxu1 %v83_v39  ;;  %v535_v39 = vld [vmem:[%s2670_s3 + $0x20] sm:$0xff] }
  0x5d   :  { %470 = vmatpush1.msra.mxu0 %v134_v38  ;;  %1247 = vmatpush3.msra.mxu1 %v35_v40  ;;  %v637_v38 = vld [vmem:[%s2670_s3 + $0x350] sm:$0xff]  ;;  %v636_v40 = vld [vmem:[%s2670_s3 + $0x348] sm:$0xff] }
  0x5e   :  { %471 = vmatprep.subr.mxu0 %v1414_v1  ;;  %1248 = vmatprep.subr.mxu1 %v80_v42  ;;  %v634_v42 = vld [vmem:[%s2670_s3 + $0x338] sm:$0xff] }
  0x5f   :  { %472 = vmatpush1.msra.mxu0 %v131_v41  ;;  %1249 = vmatpush3.msra.mxu1 %v32_v43  ;;  %v534_v41 = vld [vmem:[%s2670_s3 + $0x18] sm:$0xff]  ;;  %v532_v43 = vld [vmem:[%s2670_s3 + $0x8] sm:$0xff] }
  0x60   :  { %473 = vmatprep.subr.mxu0 %v1414_v1  ;;  %437 = vmatprep.mubr.f32.mxu1 %v1790_v46  ;;  %v200_v46 = vld [vmem:[%s2668_s1 + $0x550] sm:$0xff] }
  0x61   :  { %474 = vmatpush1.msra.mxu0 %v128_v44  ;;  %438 = vmatmul.mubr.f32.vlgmr.msra.gmra.mxu1 %v1844_v61  ;;  %v573_v61 = vld [vmem:[%s2670_s3 + $0x150] sm:$0xff] }
  0x62   :  { %483 = vmatprep.subr.mxu0 %v1414_v1  ;;  %1209 = vmatprep.mubr.msk.f32.mxu0 %vm227_vm0, %v1817_v54  ;;  %v182_v54 = vld [vmem:[%s2668_s1 + $0x4c0] sm:$0xff]  ;;  %v633_v44 = vld [vmem:[%s2670_s3 + $0x330] sm:$0xff] }
  0x63   :  { %484 = vmatpush2.msra.mxu0 %v209_v45  ;;  %694 = vmatprep.subr.mxu1 %v577_v58  ;;  %v531_v45 = vld [vmem:[%s2670_s3] sm:$0xff]  ;;  %v613_v58 = vld [vmem:[%s2670_s3 + $0x290] sm:$0xff] }
  0x64   :  { %485 = vmatprep.subr.mxu0 %v1414_v1  ;;  %695 = vmatpush1.msra.mxu1 %v576_v59  ;;  %v612_v59 = vld [vmem:[%s2670_s3 + $0x288] sm:$0xff] }
  0x65   :  { %486 = vmatpush2.msra.mxu0 %v206_v47  ;;  %696 = vmatprep.subr.mxu1 %v574_v60  ;;  %v631_v47 = vld [vmem:[%s2670_s3 + $0x320] sm:$0xff]  ;;  %v610_v60 = vld [vmem:[%s2670_s3 + $0x278] sm:$0xff] }
  0x66   :  { %487 = vmatprep.subr.mxu0 %v1414_v1  ;;  %697 = vmatpush1.msra.mxu1 %v573_v61  ;;  %v609_v61 = vld [vmem:[%s2670_s3 + $0x270] sm:$0xff] }
  0x67   :  { %488 = vmatpush2.msra.mxu0 %v203_v48  ;;  %v625_v48 = vld [vmem:[%s2670_s3 + $0x2f0] sm:$0xff] }
  0x68   :  { %489 = vmatprep.subr.mxu0 %v1414_v1 }
  0x69   :  { %490 = vmatpush2.msra.mxu0 %v200_v46  ;;  %v630_v46 = vld [vmem:[%s2670_s3 + $0x318] sm:$0xff] }
  0x6a   :  { %491 = vmatprep.subr.mxu0 %v1414_v1 }
  0x6b   :  { %492 = vmatpush2.msra.mxu0 %v197_v49  ;;  %v624_v49 = vld [vmem:[%s2670_s3 + $0x2e8] sm:$0xff] }
  0x6c   :  { %493 = vmatprep.subr.mxu0 %v1414_v1 }
  0x6d   :  { %494 = vmatpush2.msra.mxu0 %v194_v50  ;;  %v628_v50 = vld [vmem:[%s2670_s3 + $0x308] sm:$0xff] }
  0x6e   :  { %495 = vmatprep.subr.mxu0 %v1414_v1 }
  0x6f   :  { %496 = vmatpush2.msra.mxu0 %v191_v51  ;;  %v622_v51 = vld [vmem:[%s2670_s3 + $0x2d8] sm:$0xff] }
  0x70   :  { %497 = vmatprep.subr.mxu0 %v1414_v1 }
  0x71   :  { %498 = vmatpush2.msra.mxu0 %v188_v52  ;;  %v621_v52 = vld [vmem:[%s2670_s3 + $0x2d0] sm:$0xff] }
  0x72   :  { %499 = vmatprep.subr.mxu0 %v1414_v1 }
  0x73   :  { %500 = vmatpush2.msra.mxu0 %v185_v53  ;;  %v619_v53 = vld [vmem:[%s2670_s3 + $0x2c0] sm:$0xff] }
  0x74   :  { %501 = vmatprep.subr.mxu0 %v1414_v1 }
  0x75   :  { %502 = vmatpush2.msra.mxu0 %v182_v54  ;;  %v618_v54 = vld [vmem:[%s2670_s3 + $0x2b8] sm:$0xff] }
  0x76   :  { %503 = vmatprep.subr.mxu0 %v1414_v1 }
  0x77   :  { %504 = vmatpush2.msra.mxu0 %v179_v55  ;;  %v616_v55 = vld [vmem:[%s2670_s3 + $0x2a8] sm:$0xff] }
  0x78   :  { %505 = vmatprep.subr.mxu0 %v1414_v1 }
  0x79   :  { %506 = vmatpush2.msra.mxu0 %v176_v57  ;;  %v615_v57 = vld [vmem:[%s2670_s3 + $0x2a0] sm:$0xff] }
  0x7a   :  { %508 = vmatmul.mubr.f32.vlgmr.msra.gmra.mxu0 %v1825_v56  ;;  %v571_v56 = vld [vmem:[%s2670_s3 + $0x140] sm:$0xff]  ;;  %1210 = vmatprep.subr.msk.mxu0 %vm684_vm1, %v661_v8  ;;  %v592_v8 = vld [vmem:[%s2670_s3 + $0x1e8] sm:$0xff] }
  0x7b   :  { %829 = vmatprep.mubr.f32.mxu0 %v1414_v1  ;;  %698 = vmatprep.subr.mxu1 %v571_v56  ;;  %v607_v56 = vld [vmem:[%s2670_s3 + $0x260] sm:$0xff] }
  0x7c   :  { %699 = vmatpush1.msra.mxu1 %v570_v62  ;;  %1211 = vmatpush1.msk.msra.mxu0 %vm684_vm1, %v660_v9  ;;  %v606_v62 = vld [vmem:[%s2670_s3 + $0x258] sm:$0xff]  ;;  %v212_v9 = vlaneseq }
  0x7d   :  { %700 = vmatprep.subr.mxu1 %v568_v63  ;;  %775 = vmatprep.subr.mxu0 %v658_v11  ;;  %v604_v63 = vld [vmem:[%s2670_s3 + $0x248] sm:$0xff] }
  0x7e   :  { %701 = vmatpush1.msra.mxu1 %v567_v0  ;;  %776 = vmatpush1.msra.mxu0 %v657_v13  ;;  %v603_v0 = vld [vmem:[%s2670_s3 + $0x240] sm:$0xff]  ;;  %v2292_v11 = vshrl.u32 %v212_v9, 7  ;;  %v653_v9 = vld [vmem:[%s2670_s3 + $0x3d0] sm:$0xff] }
  0x7f   :  { %702 = vmatprep.subr.mxu1 %v565_v2  ;;  %777 = vmatprep.subr.mxu0 %v655_v14  ;;  %v601_v2 = vld [vmem:[%s2670_s3 + $0x230] sm:$0xff]  ;;  %v210_v14 = vld [vmem:[%s2671_s2] sm:$0x7] }
  0x80   :  { %703 = vmatpush1.msra.mxu1 %v564_v3  ;;  %778 = vmatpush1.msra.mxu0 %v654_v16  ;;  %v600_v3 = vld [vmem:[%s2670_s3 + $0x228] sm:$0xff]  ;;  %v218_v16 = vsub.s32 1, %v2292_v11 }
  0x81   :  { %704 = vmatprep.subr.mxu1 %v562_v4  ;;  %779 = vmatprep.subr.mxu0 %v652_v18  ;;  %v598_v4 = vld [vmem:[%s2670_s3 + $0x218] sm:$0xff]  ;;  %v627_v18 = vld [vmem:[%s2670_s3 + $0x300] sm:$0xff] }
  0x82   :  { %705 = vmatpush1.msra.mxu1 %v561_v5  ;;  %780 = vmatpush1.msra.mxu0 %v651_v20  ;;  %v597_v5 = vld [vmem:[%s2670_s3 + $0x210] sm:$0xff] }
  0x83   :  { %706 = vmatprep.subr.mxu1 %v559_v6  ;;  %781 = vmatprep.subr.mxu0 %v649_v22  ;;  %v595_v6 = vld [vmem:[%s2670_s3 + $0x200] sm:$0xff]  ;;  %v589_v20 = vld [vmem:[%s2670_s3 + $0x1d0] sm:$0xff]  ;;  %v588_v22 = vld [vmem:[%s2670_s3 + $0x1c8] sm:$0xff] }
  0x84   :  { %707 = vmatpush1.msra.mxu1 %v558_v7  ;;  %782 = vmatpush1.msra.mxu0 %v648_v24  ;;  %v594_v7 = vld [vmem:[%s2670_s3 + $0x1f8] sm:$0xff] }
  0x85   :  { %708 = vmatprep.subr.mxu1 %v556_v10  ;;  %783 = vmatprep.subr.mxu0 %v646_v26  ;;  %v219_v26 = vrot.slane %v210_v14, %v218_v16 }
  0x86   :  { %709 = vmatpush1.msra.mxu1 %v555_v12  ;;  %784 = vmatpush1.msra.mxu0 %v645_v28 }
  0x87   :  { %710 = vmatprep.subr.mxu1 %v553_v15  ;;  %785 = vmatprep.subr.mxu0 %v643_v30  ;;  %v214_v15 = vsub.s32 0, %v2292_v11 }
  0x88   :  { %711 = vmatpush1.msra.mxu1 %v552_v17  ;;  %786 = vmatpush1.msra.mxu0 %v642_v32  ;;  %v591_v17 = vld [vmem:[%s2670_s3 + $0x1e0] sm:$0xff] }
  0x89   :  { %712 = vmatprep.subr.mxu1 %v550_v19  ;;  %787 = vmatprep.subr.mxu0 %v640_v34  ;;  %v583_v32 = vld [vmem:[%s2670_s3 + $0x1a0] sm:$0xff] }
  0x8a   :  { %713 = vmatpush1.msra.mxu1 %v549_v21  ;;  %788 = vmatpush1.msra.mxu0 %v639_v36  ;;  %v626_v21 = vld [vmem:[%s2670_s3 + $0x2f8] sm:$0xff]  ;;  %v580_v36 = vld [vmem:[%s2670_s3 + $0x188] sm:$0xff] }
  0x8b   :  { %714 = vmatprep.subr.mxu1 %v547_v23  ;;  %789 = vmatprep.subr.mxu0 %v637_v38  ;;  %v222_v23 = vsub.s32 2, %v2292_v11 }
  0x8c   :  { %715 = vmatpush1.msra.mxu1 %v546_v25  ;;  %790 = vmatpush1.msra.mxu0 %v636_v40  ;;  %v215_v25 = vrot.slane %v210_v14, %v214_v15 }
  0x8d   :  { %716 = vmatprep.subr.mxu1 %v544_v27  ;;  %791 = vmatprep.subr.mxu0 %v634_v42  ;;  %v586_v27 = vld [vmem:[%s2670_s3 + $0x1b8] sm:$0xff] }
  0x8e   :  { %717 = vmatpush1.msra.mxu1 %v543_v29  ;;  %792 = vmatpush1.msra.mxu0 %v633_v44  ;;  %v585_v29 = vld [vmem:[%s2670_s3 + $0x1b0] sm:$0xff] }
  0x8f   :  { %718 = vmatprep.subr.mxu1 %v541_v31  ;;  %793 = vmatprep.subr.mxu0 %v631_v47  ;;  %v223_v31 = vrot.slane %v210_v14, %v222_v23  ;;  %v599_v14 = vld [vmem:[%s2670_s3 + $0x220] sm:$0xff] }
  0x90   :  { %719 = vmatpush1.msra.mxu1 %v540_v33  ;;  %794 = vmatpush1.msra.mxu0 %v630_v46  ;;  %v582_v33 = vld [vmem:[%s2670_s3 + $0x198] sm:$0xff]  ;;  %v623_v46 = vld [vmem:[%s2670_s3 + $0x2e0] sm:$0xff] }
  0x91   :  { %720 = vmatprep.subr.mxu1 %v538_v35  ;;  %795 = vmatprep.subr.mxu0 %v628_v50 }
  0x92   :  { %721 = vmatpush1.msra.mxu1 %v537_v37  ;;  %796 = vmatpush1.msra.mxu0 %v627_v18  ;;  %v579_v37 = vld [vmem:[%s2670_s3 + $0x180] sm:$0xff] }
  0x93   :  { %722 = vmatprep.subr.mxu1 %v535_v39  ;;  %1253 = vmatprep.subr.mxu0 %v626_v21  ;;  %v647_v18 = vld [vmem:[%s2670_s3 + $0x3a0] sm:$0xff]  ;;  %v644_v21 = vld [vmem:[%s2670_s3 + $0x388] sm:$0xff] }
  0x94   :  { %723 = vmatpush1.msra.mxu1 %v534_v41 }
  0x95   :  { %724 = vmatprep.subr.mxu1 %v532_v43 }
  0x96   :  { %725 = vmatpush1.msra.mxu1 %v531_v45 }
  0x97   :  { %726 = vmatprep.subr.mxu1 %v625_v48  ;;  %v578_v48 = vld [vmem:[%s2670_s3 + $0x178] sm:$0xff] }
  0x98   :  { %727 = vmatpush2.msra.mxu1 %v624_v49  ;;  %v575_v49 = vld [vmem:[%s2670_s3 + $0x160] sm:$0xff] }
  0x99   :  { %728 = vmatprep.subr.mxu1 %v622_v51  ;;  %v620_v51 = vld [vmem:[%s2670_s3 + $0x2c8] sm:$0xff] }
  0x9a   :  { %729 = vmatpush2.msra.mxu1 %v621_v52 }
  0x9b   :  { %730 = vmatprep.subr.mxu1 %v619_v53 }
  0x9c   :  { %731 = vmatpush2.msra.mxu1 %v618_v54  ;;  %v572_v54 = vld [vmem:[%s2670_s3 + $0x148] sm:$0xff] }
  0x9d   :  { %732 = vmatprep.subr.mxu1 %v616_v55  ;;  %v617_v55 = vld [vmem:[%s2670_s3 + $0x2b0] sm:$0xff] }
  0x9e   :  { %733 = vmatpush2.msra.mxu1 %v615_v57 }
  0x9f   :  { %734 = vmatprep.subr.mxu1 %v613_v58  ;;  %v569_v58 = vld [vmem:[%s2670_s3 + $0x130] sm:$0xff] }
  0xa0   :  { %735 = vmatpush2.msra.mxu1 %v612_v59 }
  0xa1   :  { %736 = vmatprep.subr.mxu1 %v610_v60 }
  0xa2   :  { %737 = vmatpush2.msra.mxu1 %v609_v61 }
  0xa3   :  { %738 = vmatprep.subr.mxu1 %v607_v56  ;;  %v614_v56 = vld [vmem:[%s2670_s3 + $0x298] sm:$0xff] }
  0xa4   :  { %739 = vmatpush2.msra.mxu1 %v606_v62  ;;  %v566_v62 = vld [vmem:[%s2670_s3 + $0x118] sm:$0xff] }
  0xa5   :  { %740 = vmatprep.subr.mxu1 %v604_v63  ;;  %v662_v63 = vld [vmem:[%s2670_s3 + $0x418] sm:$0xf] }
  0xa6   :  { %741 = vmatpush2.msra.mxu1 %v603_v0  ;;  %v611_v0 = vld [vmem:[%s2670_s3 + $0x280] sm:$0xff] }
  0xa7   :  { %742 = vmatprep.subr.mxu1 %v601_v2  ;;  %v563_v2 = vld [vmem:[%s2670_s3 + $0x100] sm:$0xff] }
  0xa8   :  { %743 = vmatpush2.msra.mxu1 %v600_v3  ;;  %v659_v3 = vld [vmem:[%s2670_s3 + $0x400] sm:$0xff] }
  0xa9   :  { %744 = vmatprep.subr.mxu1 %v598_v4  ;;  %v608_v4 = vld [vmem:[%s2670_s3 + $0x268] sm:$0xff] }
  0xaa   :  { %745 = vmatpush2.msra.mxu1 %v597_v5  ;;  %v560_v5 = vld [vmem:[%s2670_s3 + $0xe8] sm:$0xff] }
  0xab   :  { %746 = vmatprep.subr.mxu1 %v595_v6  ;;  %v656_v6 = vld [vmem:[%s2670_s3 + $0x3e8] sm:$0xff] }
  0xac   :  { %747 = vmatpush2.msra.mxu1 %v594_v7  ;;  %v605_v7 = vld [vmem:[%s2670_s3 + $0x250] sm:$0xff] }
  0xad   :  { %748 = vmatprep.subr.mxu1 %v592_v8  ;;  %v557_v8 = vld [vmem:[%s2670_s3 + $0xd0] sm:$0xff] }
  0xae   :  { %749 = vmatpush2.msra.mxu1 %v591_v17  ;;  %v551_v17 = vld [vmem:[%s2670_s3 + $0xa0] sm:$0xff] }
  0xaf   :  { %750 = vmatprep.subr.mxu1 %v589_v20  ;;  %v548_v20 = vld [vmem:[%s2670_s3 + $0x88] sm:$0xff] }
  0xb0   :  { %751 = vmatpush2.msra.mxu1 %v588_v22  ;;  %v593_v22 = vld [vmem:[%s2670_s3 + $0x1f0] sm:$0xff] }
  0xb1   :  { %752 = vmatprep.subr.mxu1 %v586_v27  ;;  %v542_v27 = vld [vmem:[%s2670_s3 + $0x58] sm:$0xff] }
  0xb2   :  { %753 = vmatpush2.msra.mxu1 %v585_v29  ;;  %v587_v29 = vld [vmem:[%s2670_s3 + $0x1c0] sm:$0xff] }
  0xb3   :  { %754 = vmatprep.subr.mxu1 %v583_v32  ;;  %v584_v32 = vld [vmem:[%s2670_s3 + $0x1a8] sm:$0xff] }
  0xb4   :  { %755 = vmatpush2.msra.mxu1 %v582_v33  ;;  %v536_v33 = vld [vmem:[%s2670_s3 + $0x28] sm:$0xff] }
  0xb5   :  { %756 = vmatprep.subr.mxu1 %v580_v36  ;;  %v533_v36 = vld [vmem:[%s2670_s3 + $0x10] sm:$0xff] }
  0xb6   :  { %757 = vmatpush2.msra.mxu1 %v579_v37  ;;  %v629_v37 = vld [vmem:[%s2670_s3 + $0x310] sm:$0xff] }
  0xb7   :  { %1347 = vmatprep.subr.mxu1 %v1414_v1 }
  0xfe   :  { %v368_v10 = vpop.f32.mrf.mxu1 }
 0x100   :  { %v370_v12 = vpop.f32.mrf.mxu1 }
 0x102   :  { %v297_v19 = vpop.f32.mrf.mxu0 }
 0x103   :  { %v298_v34 = vadd.f32 %v297_v19, %v215_v25  ;;  %v596_v19 = vld [vmem:[%s2670_s3 + $0x208] sm:$0xff]  ;;  %v641_v25 = vld [vmem:[%s2670_s3 + $0x370] sm:$0xff] }
 0x104   :  { %v299_v28 = vpop.f32.mrf.mxu0 }
 0x105   :  { %v300_v35 = vadd.f32 %v299_v28, %v219_v26  ;;  %v369_v40 = vadd.f32 %v368_v10, %v298_v34  ;;  %v602_v10 = vld [vmem:[%s2670_s3 + $0x238] sm:$0xff]  ;;  %v632_v34 = vld [vmem:[%s2670_s3 + $0x328] sm:$0xff] }
 0x106   :  { %v590_v26 = vld [vmem:[%s2670_s3 + $0x1d8] sm:$0xff] }
 0x107   :  { %v371_v41 = vadd.f32 %v370_v12, %v300_v35  ;;  %v554_v12 = vld [vmem:[%s2670_s3 + $0xb8] sm:$0xff]  ;;  %v581_v35 = vld [vmem:[%s2670_s3 + $0x190] sm:$0xff] }
 0x108   :  { %v638_v28 = vld [vmem:[%s2670_s3 + $0x358] sm:$0xff] }
 0x109   :  { %v1400_v44 = vpack.i.bf16 %v369_v40, %v371_v41 }
 0x121   :  { %v1250_v13 = vpop.f32.mrf.mxu1 }
 0x123   :  { %v1251_v24 = vpop.f32.mrf.mxu1 }
 0x124   :  { %v1252_v30 = vadd.f32 %v1251_v24, %v1250_v13  ;;  %v650_v13 = vld [vmem:[%s2670_s3 + $0x3b8] sm:$0xff]  ;;  %v545_v24 = vld [vmem:[%s2670_s3 + $0x70] sm:$0xff] }
 0x126   :  { %v440_v38 = vadd.f32 %v1252_v30, %v223_v31  ;;  %v539_v30 = vld [vmem:[%s2670_s3 + $0x40] sm:$0xff] }
 0x127   :  { %v635_v31 = vld [vmem:[%s2670_s3 + $0x340] sm:$0xff] }
 0x13a   :  { %v509_v39 = vpop.f32.mrf.mxu0 }
 0x13b   :  { %v510_v42 = vadd.f32 %v509_v39, %v440_v38  ;;  %v1024_v38 = vld [vmem:[%s2672_s5 + $0xf8] sm:$0xff] }
 0x13c   :  { %v511_v43 = vpop.f32.mrf.mxu0  ;;  %v1008_v39 = vld [vmem:[%s2672_s5 + $0x78] sm:$0xff] }
 0x13d   :  { %520 = vrot.lane.b32.xlu0 %v510_v42, %s1415_s23  ;;  %v2516_v43 = vld [vmem:[%s2673_s4] sm:$0x7] }
 0x141   :  { %1401 = vrot.lane.b32.xlu0 %v1400_v44, %s1415_s23  ;;  %v1006_v44 = vld [vmem:[%s2672_s5 + $0x68] sm:$0xff] }
 0x1af   :  { %v521_v45 = vpop.permute.xlu0 %520 }
 0x1b0   :  { %v2342_v47 = vmax.f32 %v510_v42, %v521_v45  ;;  %v1022_v42 = vld [vmem:[%s2672_s5 + $0xe8] sm:$0xff] }
 0x1b2   :  { %1212 = vmatmul.mubr.msk.f32.vlgmr.msra.gmra.mxu0 %vm680_vm2, %v2342_v47 }
 0x1b3   :  { %1254 = vmatpush3.msra.mxu0 %v578_v48  ;;  %v1402_v50 = vpop.permute.xlu0 %1401  ;;  %v1005_v48 = vld [vmem:[%s2672_s5 + $0x60] sm:$0xff] }
 0x1b4   :  { %1255 = vmatprep.subr.mxu0 %v623_v46  ;;  %v1404_v52 = vunpack.i.h.bf16 %v1402_v50  ;;  %v1403_v53 = vunpack.i.l.bf16 %v1402_v50  ;;  %v672_v46 = vrot.slane %v2516_v43, %v218_v16  ;;  %v1019_v50 = vld [vmem:[%s2672_s5 + $0xd0] sm:$0xff] }
 0x1b5   :  { %1256 = vmatpush3.msra.mxu0 %v575_v49  ;;  %v1020_v49 = vld [vmem:[%s2672_s5 + $0xd8] sm:$0xff]  ;;  %v1003_v16 = vld [vmem:[%s2672_s5 + $0x50] sm:$0xff] }
 0x1b6   :  { %v523_v57 = vsel %vm522_vm3, %v1404_v52, %v1403_v53  ;;  %1257 = vmatprep.subr.mxu0 %v620_v51  ;;  %v524_v59 = vsel %vm522_vm3, %v1403_v53, %v521_v45  ;;  %v668_v45 = vrot.slane %v2516_v43, %v214_v15  ;;  %v1004_v15 = vld [vmem:[%s2672_s5 + $0x58] sm:$0xff]  ;;  %v1034_v53 = vld [vmem:[%s2672_s5 + $0x148] sm:$0x3] }
 0x1b7   :  { %v2369_v60 = vmax.f32 %v369_v40, %v523_v57  ;;  %1258 = vmatpush3.msra.mxu0 %v572_v54  ;;  %v529_v61 = vmax.f32 %v371_v41, %v524_v59  ;;  %v1023_v40 = vld [vmem:[%s2672_s5 + $0xf0] sm:$0xff]  ;;  %v1033_v57 = vld [vmem:[%s2672_s5 + $0x140] sm:$0xff]  ;;  %v1002_v59 = vld [vmem:[%s2672_s5 + $0x48] sm:$0xff] }
 0x1b8   :  { %1259 = vmatprep.subr.mxu0 %v617_v55  ;;  %v1007_v41 = vld [vmem:[%s2672_s5 + $0x70] sm:$0xff]  ;;  %v1018_v55 = vld [vmem:[%s2672_s5 + $0xc8] sm:$0xff] }
 0x1b9   :  { %1260 = vmatpush3.msra.mxu0 %v569_v58  ;;  %758 = vmatprep.mubr.f32.mxu1 %v529_v61 }
 0x1ba   :  { %1261 = vmatprep.subr.mxu0 %v614_v56  ;;  %900 = vmatprep.mubr.f32.mxu0 %v529_v61  ;;  %v1017_v56 = vld [vmem:[%s2672_s5 + $0xc0] sm:$0xff] }
 0x1bb   :  { %759 = vmatmul.mubr.f32.vlgmr.msra.gmra.mxu1 %v2369_v60  ;;  %1262 = vmatpush3.msra.mxu0 %v566_v62 }
 0x1bc   :  { %1348 = vmatpush3.msk.msra.mxu1 %vm684_vm1, %v662_v63  ;;  %1263 = vmatprep.subr.mxu0 %v611_v0  ;;  %v1001_v63 = vld [vmem:[%s2672_s5 + $0x40] sm:$0xff]  ;;  %v1031_v0 = vld [vmem:[%s2672_s5 + $0x130] sm:$0xff] }
 0x1bd   :  { %1349 = vmatprep.subr.mxu1 %v1414_v1  ;;  %1264 = vmatpush3.msra.mxu0 %v563_v2 }
 0x1be   :  { %1350 = vmatpush3.msra.mxu1 %v659_v3  ;;  %1265 = vmatprep.subr.mxu0 %v608_v4  ;;  %v1016_v4 = vld [vmem:[%s2672_s5 + $0xb8] sm:$0xff] }
 0x1bf   :  { %1351 = vmatprep.subr.mxu1 %v1414_v1  ;;  %1266 = vmatpush3.msra.mxu0 %v560_v5  ;;  %v1000_v5 = vld [vmem:[%s2672_s5 + $0x38] sm:$0xff] }
 0x1c0   :  { %1352 = vmatpush3.msra.mxu1 %v656_v6  ;;  %1267 = vmatprep.subr.mxu0 %v605_v7  ;;  %v1015_v7 = vld [vmem:[%s2672_s5 + $0xb0] sm:$0xff] }
 0x1c1   :  { %1353 = vmatprep.subr.mxu1 %v1414_v1  ;;  %1268 = vmatpush3.msra.mxu0 %v557_v8  ;;  %v1030_v8 = vld [vmem:[%s2672_s5 + $0x128] sm:$0xff] }
 0x1c2   :  { %1354 = vmatpush3.msra.mxu1 %v653_v9  ;;  %1269 = vmatprep.subr.mxu0 %v602_v10  ;;  %v999_v9 = vld [vmem:[%s2672_s5 + $0x30] sm:$0xff]  ;;  %v1014_v10 = vld [vmem:[%s2672_s5 + $0xa8] sm:$0xff] }
 0x1c3   :  { %1355 = vmatprep.subr.mxu1 %v1414_v1  ;;  %1270 = vmatpush3.msra.mxu0 %v554_v12  ;;  %v1029_v12 = vld [vmem:[%s2672_s5 + $0x120] sm:$0xff] }
 0x1c4   :  { %1356 = vmatpush3.msra.mxu1 %v650_v13  ;;  %1271 = vmatprep.subr.mxu0 %v599_v14  ;;  %v998_v13 = vld [vmem:[%s2672_s5 + $0x28] sm:$0xff]  ;;  %v1013_v14 = vld [vmem:[%s2672_s5 + $0xa0] sm:$0xff] }
 0x1c5   :  { %1357 = vmatprep.subr.mxu1 %v1414_v1  ;;  %1272 = vmatpush3.msra.mxu0 %v551_v17  ;;  %v1028_v17 = vld [vmem:[%s2672_s5 + $0x118] sm:$0xff] }
 0x1c6   :  { %1358 = vmatpush3.msra.mxu1 %v647_v18  ;;  %1273 = vmatprep.subr.mxu0 %v596_v19  ;;  %v997_v18 = vld [vmem:[%s2672_s5 + $0x20] sm:$0xff]  ;;  %v1012_v19 = vld [vmem:[%s2672_s5 + $0x98] sm:$0xff] }
 0x1c7   :  { %1359 = vmatprep.subr.mxu1 %v1414_v1  ;;  %1274 = vmatpush3.msra.mxu0 %v548_v20  ;;  %v1027_v20 = vld [vmem:[%s2672_s5 + $0x110] sm:$0xff] }
 0x1c8   :  { %1360 = vmatpush3.msra.mxu1 %v644_v21  ;;  %1275 = vmatprep.subr.mxu0 %v593_v22  ;;  %v996_v21 = vld [vmem:[%s2672_s5 + $0x18] sm:$0xff]  ;;  %v1011_v22 = vld [vmem:[%s2672_s5 + $0x90] sm:$0xff] }
 0x1c9   :  { %1361 = vmatprep.subr.mxu1 %v1414_v1  ;;  %1276 = vmatpush3.msra.mxu0 %v545_v24  ;;  %v1026_v24 = vld [vmem:[%s2672_s5 + $0x108] sm:$0xff] }
 0x1ca   :  { %1362 = vmatpush3.msra.mxu1 %v641_v25  ;;  %1277 = vmatprep.subr.mxu0 %v590_v26  ;;  %v995_v25 = vld [vmem:[%s2672_s5 + $0x10] sm:$0xff]  ;;  %v1010_v26 = vld [vmem:[%s2672_s5 + $0x88] sm:$0xff] }
 0x1cb   :  { %1363 = vmatprep.subr.mxu1 %v1414_v1  ;;  %1278 = vmatpush3.msra.mxu0 %v542_v27  ;;  %v994_v27 = vld [vmem:[%s2672_s5 + $0x8] sm:$0xff] }
 0x1cc   :  { %1364 = vmatpush3.msra.mxu1 %v638_v28  ;;  %1279 = vmatprep.subr.mxu0 %v587_v29  ;;  %v1025_v28 = vld [vmem:[%s2672_s5 + $0x100] sm:$0xff] }
 0x1cd   :  { %1365 = vmatprep.subr.mxu1 %v1414_v1  ;;  %1280 = vmatpush3.msra.mxu0 %v539_v30  ;;  %v1009_v29 = vld [vmem:[%s2672_s5 + $0x80] sm:$0xff] }
 0x1ce   :  { %1366 = vmatpush3.msra.mxu1 %v635_v31  ;;  %1281 = vmatprep.subr.mxu0 %v584_v32  ;;  %v676_v32 = vrot.slane %v2516_v43, %v222_v23 }
 0x1cf   :  { %1367 = vmatprep.subr.mxu1 %v1414_v1  ;;  %1282 = vmatpush3.msra.mxu0 %v536_v33 }
 0x1d0   :  { %1368 = vmatpush3.msra.mxu1 %v632_v34  ;;  %1283 = vmatprep.subr.mxu0 %v581_v35 }
 0x1d1   :  { %1369 = vmatprep.subr.mxu1 %v1414_v1  ;;  %1284 = vmatpush3.msra.mxu0 %v533_v36 }
 0x1d2   :  { %1370 = vmatpush3.msra.mxu1 %v629_v37  ;;  %1371 = vmatprep.mubr.msk.f32.mxu1 %vm1416_vm4, %v1414_v1 }
 0x1d3   :  { %901 = vmatmul.mubr.f32.vlgmr.msra.gmra.mxu0 %v2369_v60  ;;  %1372 = vmatmul.mubr.msk.f32.vlgmr.msra.gmra.mxu1 %vm680_vm2, %v2342_v47  ;;  %v1021_v47 = vld [vmem:[%s2672_s5 + $0xe0] sm:$0xff]  ;;  %v1032_v60 = vld [vmem:[%s2672_s5 + $0x138] sm:$0xff] }
 0x1d4   :  { %1374 = vmatprep.subr.mxu1 %v1414_v1  ;;  %1394 = vmatprep.mubr.msk.f32.mxu1 %vm1416_vm4, %v1414_v1 }
 0x1d5   :  { %1301 = vmatprep.subr.mxu0 %v1024_v38  ;;  %1375 = vmatpush3.msk.msra.mxu1 %vm1046_vm5, %v1034_v53 }
 0x1d6   :  { %1302 = vmatpush3.msra.mxu0 %v1008_v39  ;;  %1376 = vmatprep.subr.mxu1 %v1414_v1 }
 0x1d7   :  { %1303 = vmatprep.subr.mxu0 %v1023_v40  ;;  %1377 = vmatpush3.msra.mxu1 %v1033_v57 }
 0x1d8   :  { %1304 = vmatpush3.msra.mxu0 %v1007_v41  ;;  %1378 = vmatprep.subr.mxu1 %v1414_v1 }
 0x1d9   :  { %1305 = vmatprep.subr.mxu0 %v1022_v42  ;;  %1379 = vmatpush3.msra.mxu1 %v1032_v60 }
 0x1da   :  { %1306 = vmatpush3.msra.mxu0 %v1006_v44  ;;  %1380 = vmatprep.subr.mxu1 %v1414_v1 }
 0x1db   :  { %1307 = vmatprep.subr.mxu0 %v1021_v47  ;;  %1381 = vmatpush3.msra.mxu1 %v1031_v0 }
 0x1dc   :  { %1308 = vmatpush3.msra.mxu0 %v1005_v48  ;;  %1382 = vmatprep.subr.mxu1 %v1414_v1 }
 0x1dd   :  { %1309 = vmatprep.subr.mxu0 %v1020_v49  ;;  %1383 = vmatpush3.msra.mxu1 %v1030_v8 }
 0x1de   :  { %1310 = vmatpush3.msra.mxu0 %v1004_v15  ;;  %1384 = vmatprep.subr.mxu1 %v1414_v1 }
 0x1df   :  { %1311 = vmatprep.subr.mxu0 %v1019_v50  ;;  %1385 = vmatpush3.msra.mxu1 %v1029_v12 }
 0x1e0   :  { %1312 = vmatpush3.msra.mxu0 %v1003_v16  ;;  %1386 = vmatprep.subr.mxu1 %v1414_v1 }
 0x1e1   :  { %1313 = vmatprep.subr.mxu0 %v1018_v55  ;;  %1387 = vmatpush3.msra.mxu1 %v1028_v17 }
 0x1e2   :  { %1314 = vmatpush3.msra.mxu0 %v1002_v59  ;;  %1388 = vmatprep.subr.mxu1 %v1414_v1 }
 0x1e3   :  { %1315 = vmatprep.subr.mxu0 %v1017_v56  ;;  %1389 = vmatpush3.msra.mxu1 %v1027_v20 }
 0x1e4   :  { %1316 = vmatpush3.msra.mxu0 %v1001_v63  ;;  %1390 = vmatprep.subr.mxu1 %v1414_v1 }
 0x1e5   :  { %1317 = vmatprep.subr.mxu0 %v1016_v4  ;;  %1391 = vmatpush3.msra.mxu1 %v1026_v24 }
 0x1e6   :  { %1318 = vmatpush3.msra.mxu0 %v1000_v5  ;;  %1392 = vmatprep.subr.mxu1 %v1414_v1  ;;  %v993_v1 = vld [vmem:[%s2672_s5] sm:$0xff] }
 0x1e7   :  { %1319 = vmatprep.subr.mxu0 %v1015_v7  ;;  %1393 = vmatpush3.msra.mxu1 %v1025_v28 }
 0x1e8   :  { %1320 = vmatpush3.msra.mxu0 %v999_v9 }
 0x1e9   :  { %1321 = vmatprep.subr.mxu0 %v1014_v10 }
 0x1ea   :  { %1322 = vmatpush3.msra.mxu0 %v998_v13 }
 0x1eb   :  { %1323 = vmatprep.subr.mxu0 %v1013_v14 }
 0x1ec   :  { %1324 = vmatpush3.msra.mxu0 %v997_v18 }
 0x1ed   :  { %1325 = vmatprep.subr.mxu0 %v1012_v19 }
 0x1ee   :  { %1326 = vmatpush3.msra.mxu0 %v996_v21 }
 0x1ef   :  { %1327 = vmatprep.subr.mxu0 %v1011_v22 }
 0x1f0   :  { %1328 = vmatpush3.msra.mxu0 %v995_v25 }
 0x1f1   :  { %1329 = vmatprep.subr.mxu0 %v1010_v26 }
 0x1f2   :  { %1330 = vmatpush3.msra.mxu0 %v994_v27 }
 0x1f3   :  { %1331 = vmatprep.subr.mxu0 %v1009_v29 }
 0x1f4   :  { %1332 = vmatpush3.msra.mxu0 %v993_v1 }
 0x272   :  { %v831_v51 = vpop.f32.mrf.mxu0 }
 0x274   :  { %v833_v62 = vpop.f32.mrf.mxu0 }
 0x27b   :  { %v760_v52 = vpop.f32.mrf.mxu1 }
 0x27c   :  { %v761_v54 = vadd.f32 %v760_v52, %v668_v45 }
 0x27d   :  { %v762_v58 = vpop.f32.mrf.mxu1 }
 0x27e   :  { %v763_v61 = vadd.f32 %v762_v58, %v672_v46  ;;  %v2571_v2 = vadd.f32 %v831_v51, %v761_v54  ;;  %v1215_v46 = vld [vmem:[%s2674_s6] ss:$0 sm:$0xff] }
 0x280   :  { %v2573_v3 = vadd.f32 %v833_v62, %v763_v61 }
 0x282   :  { %v1405_v6 = vpack.i.bf16 %v2571_v2, %v2573_v3 }
 0x284   :  { %1406 = vrot.lane.b32.xlu1 %v1405_v6, %s1415_s23 }
 0x293   :  { %v1285_v30 = vpop.f32.mrf.mxu0  ;;  %v972_v31 = vpop.f32.mrf.mxu1 }
 0x295   :  { %v1286_v33 = vpop.f32.mrf.mxu0  ;;  %v1373_v34 = vpop.f32.mrf.mxu1 }
 0x296   :  { %v1287_v35 = vadd.f32 %v1286_v33, %v1285_v30 }
 0x298   :  { %v903_v36 = vadd.f32 %v1287_v35, %v676_v32 }
 0x29a   :  { %v973_v37 = vadd.f32 %v972_v31, %v903_v36 }
 0x29c   :  { %983 = vrot.lane.b32.xlu1 %v973_v37, %s1415_s23 }
 0x2f6   :  { %v1407_v38 = vpop.permute.xlu1 %1406 }
 0x2f7   :  { %v1409_v39 = vunpack.i.h.bf16 %v1407_v38  ;;  %v1408_v40 = vunpack.i.l.bf16 %v1407_v38 }
 0x2f9   :  { %v985_v41 = vsel %vm522_vm3, %v1409_v39, %v1408_v40 }
 0x2fa   :  { %v990_v23 = vmax.f32 %v2571_v2, %v985_v41 }
 0x30e   :  { %v984_v42 = vpop.permute.xlu1 %983 }
 0x30f   :  { %v986_v44 = vsel %vm522_vm3, %v1408_v40, %v984_v42  ;;  %v992_v45 = vmax.f32 %v973_v37, %v984_v42 }
 0x310   :  { %v991_v11 = vmax.f32 %v2573_v3, %v986_v44 }
 0x311   :  { %1395 = vmatmul.mubr.msk.f32.vlgmr.msra.gmra.mxu1 %vm1042_vm6, %v992_v45 }
 0x312   :  { %1114 = vmatprep.mubr.f32.mxu0 %v991_v11 }
 0x313   :  { %1115 = vmatmul.mubr.f32.vlgmr.msra.gmra.mxu0 %v990_v23 }
 0x3d1   :  { %v1186_v43 = vpop.f32.mrf.mxu1 }
 0x3d3   :  { %v1333_v47 = vpop.f32.mrf.mxu0  ;;  %v1396_v48 = vpop.f32.mrf.mxu1 }
 0x3d5   :  { %v1334_v49 = vpop.f32.mrf.mxu0 }
 0x3d6   :  { %v1335_v15 = vadd.f32 %v1334_v49, %v1333_v47 }
 0x3d8   :  { %v1117_v50 = vadd.f32 %v1335_v15, %v1215_v46 }
 0x3da   :  { %v1187_v51 = vadd.f32 %v1186_v43, %v1117_v50 }
 0x3dc   :  { %v1191_v52 = vsel %vm1190_vm7, %v1187_v51, -inf }
 0x3dd   :  { %1192 = vmax.xlane.f32.xlu0 %v1191_v52 }
 0x466   :  { %v1193_v16 = vpop.xlane.xlu0 %1192 }
 0x467   :  { %v1194_v53 = vsub.f32 %v1187_v51, %v1193_v16 }
 0x469   :  { %v1195_v54 = vmul.f32 1.442695, %v1194_v53 }
 0x46b   :  { %1410 = vpow2.f32 %v1195_v54 }
 0x478   :  { %v1411_v55 = vpop.eup %1410 }
 0x479   :  { %v1197_v57 = vsel %vm1190_vm7, %v1411_v55, 0.0 }
 0x47a   :  { %1198 = vadd.xlane.f32.xlu1 %v1197_v57 }
 0x503   :  { %v1199_v58 = vpop.xlane.xlu1 %1198 }
 0x504   :  { %1412 = vlog2.f32 %v1199_v58 }
 0x511   :  { %v1413_v59 = vpop.eup %1412 }
 0x512   :  { %v1201_v60 = vmul.f32 0.6931472, %v1413_v59 }
 0x514   :  { %v1202_v61 = vsub.f32 %v1194_v53, %v1201_v60 }
 0x516   :  { %1203 = vst.msk [vmem:[%s2675_s7] sm:$0xff] %vm1190_vm7, %v1202_v61 }

</bundles_post_ra>
